<compile_context>
chip_gen: v7x
topology: tpu7x:2x2x1
jax: 0.10.0
libtpu: 0.0.40
codegen_flags: <defaults>
</compile_context>

<pallas_src>
import functools

import jax
import jax.numpy as jnp
from jax import lax
from jax.experimental import pallas as pl
from jax.experimental.pallas import tpu as pltpu
import numpy as np


# ---------------------------------------------------------------------------
# Pass 1: stacked complex GEMM + bias + fused per-channel statistic sums
# ---------------------------------------------------------------------------
def gemm_stats_kernel(a_ref, w_ref, b_ref, y_ref, stats_ref, *,
                      tile_m, cp, m_valid):
    i = pl.program_id(0)

    # Single MXU call produces [yr | yi] (bf16 inputs, f32 accumulation).
    y = jnp.dot(a_ref[...], w_ref[...],
                preferred_element_type=jnp.float32) + b_ref[0:1, :]
    y_ref[...] = y

    yr = y[:, :cp]
    yi = y[:, cp:]

    # Mask out padded rows (only materialized when M % tile_m != 0).
    if m_valid % tile_m != 0:
        row = i * tile_m + lax.broadcasted_iota(jnp.int32, (tile_m, cp), 0)
        valid = row < m_valid
        yrm = jnp.where(valid, yr, 0.0)
        yim = jnp.where(valid, yi, 0.0)
    else:
        yrm, yim = yr, yi

    # One pass over y produces all five reductions (E[x], E[x^2], E[xy] form).
    sr = jnp.sum(yrm, axis=0, keepdims=True)
    si = jnp.sum(yim, axis=0, keepdims=True)
    srr = jnp.sum(yrm * yr, axis=0, keepdims=True)
    sii = jnp.sum(yim * yi, axis=0, keepdims=True)
    sri = jnp.sum(yrm * yi, axis=0, keepdims=True)
    z = jnp.zeros_like(sr)
    part = jnp.concatenate([sr, si, srr, sii, sri, z, z, z], axis=0)  # (8, cp)

    @pl.when(i == 0)
    def _():
        stats_ref[...] = jnp.zeros_like(stats_ref)

    stats_ref[...] += part


# ---------------------------------------------------------------------------
# Pass 2: ComplexBatchNorm (from global sums) + affine + complex leaky relu
# ---------------------------------------------------------------------------
def bn_act_kernel(y_ref, stats_ref, p_ref, o_ref, *, cp, m_valid):
    eps = 1e-5
    slope = 0.2
    inv_m = 1.0 / float(m_valid)

    y = y_ref[...]
    yr = y[:, :cp]
    yi = y[:, cp:]

    sr = stats_ref[0:1, :]
    si = stats_ref[1:2, :]
    srr = stats_ref[2:3, :]
    sii = stats_ref[3:4, :]
    sri = stats_ref[4:5, :]

    mr = sr * inv_m
    mi = si * inv_m
    crr = srr * inv_m - mr * mr + eps
    cii = sii * inv_m - mi * mi + eps
    cri = sri * inv_m - mr * mi

    # Inverse square root of the per-channel 2x2 covariance (rsqrt -> EUP).
    det = crr * cii - cri * cri
    s = jnp.sqrt(det)
    inv_st = lax.rsqrt(det) * lax.rsqrt(crr + cii + 2.0 * s)
    rrr = (cii + s) * inv_st
    rii = (crr + s) * inv_st
    rri = -cri * inv_st

    xr = yr - mr
    xi = yi - mi
    nr = rrr * xr + rri * xi
    ni = rri * xr + rii * xi

    grr = p_ref[0:1, :]
    gii = p_ref[1:2, :]
    gri = p_ref[2:3, :]
    br = p_ref[3:4, :]
    bi = p_ref[4:5, :]

    zr = grr * nr + gri * ni + br
    zi = gri * nr + gii * ni + bi

    # complex_leaky_relu(0.2, .): independent LeakyReLU on real & imag.
    zr = jnp.where(zr >= 0.0, zr, slope * zr)
    zi = jnp.where(zi >= 0.0, zi, slope * zi)
    o_ref[...] = jnp.concatenate([zr, zi], axis=1)   # lane-dense (tile_m, 2*cp)


# ---------------------------------------------------------------------------
# Wrapper (plain-JAX glue: upsample, concat, im2col, padding, pallas calls)
# ---------------------------------------------------------------------------
def _im2col(x_nhwc, kh, kw, pad):
    """[N, H, W, C] -> [N*H*W, kh*kw*C] (stride 1, zero padding `pad`)."""
    n, h, w, c = x_nhwc.shape
    xp = jnp.pad(x_nhwc, ((0, 0), (pad, pad), (pad, pad), (0, 0)))
    cols = []
    for i in range(kh):
        for j in range(kw):
            cols.append(xp[:, i:i + h, j:j + w, :])
    col = jnp.concatenate(cols, axis=-1)
    return col.reshape(n * h * w, kh * kw * c)


def _round_up(x, m):
    return (x + m - 1) // m * m


def decoder_block_forward(x, enc, params, *, kernel_size, padding,
                          scale_factor=2, tile_m=512):
    """x, enc: complex64 NCHW. Returns complex64 NCHW."""
    xr, xi = jnp.real(x).astype(jnp.float32), jnp.imag(x).astype(jnp.float32)
    er, ei = jnp.real(enc).astype(jnp.float32), jnp.imag(enc).astype(jnp.float32)

    def up(a):  # complex_upsample (nearest) == nearest on real & imag parts
        a = jnp.repeat(a, scale_factor, axis=2)
        return jnp.repeat(a, scale_factor, axis=3)

    catr = jnp.transpose(jnp.concatenate([up(xr), er], axis=1), (0, 2, 3, 1))
    cati = jnp.transpose(jnp.concatenate([up(xi), ei], axis=1), (0, 2, 3, 1))
    N, H, W, cin = catr.shape

    # TODO(synk): fold the 9-tap im2col (and the upsample/concat/transpose)
    # into the kernel with halo'd NHWC tiles to remove the 9x HBM read
    # amplification; for now the im2col matrix is at least stored in bf16.
    ar = _im2col(catr, kernel_size, kernel_size, padding)
    ai = _im2col(cati, kernel_size, kernel_size, padding)

    cout = params["w_r"].shape[-1]
    K = kernel_size * kernel_size * cin
    KP = _round_up(K, 128)      # contraction dim padded to full lanes
    CP = _round_up(cout, 128)   # output channels padded to full lanes
    M = N * H * W
    MP = _round_up(M, tile_m)
    n_tiles = MP // tile_m

    # Stacked, padded, bf16 activations  A = [ar | ai]  -> (MP, 2*KP).
    ar_p = jnp.pad(ar, ((0, MP - M), (0, KP - K)))
    ai_p = jnp.pad(ai, ((0, MP - M), (0, KP - K)))
    a = jnp.concatenate([ar_p, ai_p], axis=1).astype(jnp.bfloat16)

    # Stacked complex weight  W = [[wr, wi], [-wi, wr]]  -> (2*KP, 2*CP), bf16.
    wr2 = params["w_r"].reshape(K, cout)
    wi2 = params["w_i"].reshape(K, cout)
    w = jnp.zeros((2 * KP, 2 * CP), jnp.float32)
    w = w.at[:K, :cout].set(wr2)
    w = w.at[:K, CP:CP + cout].set(wi2)
    w = w.at[KP:KP + K, :cout].set(-wi2)
    w = w.at[KP:KP + K, CP:CP + cout].set(wr2)
    w = w.astype(jnp.bfloat16)

    # Conv bias packed as one (8, 2*CP) block, row 0 = [b_r | b_i].
    bias = jnp.zeros((8, 2 * CP), jnp.float32)
    bias = bias.at[0, :cout].set(params["b_r"].reshape(cout))
    bias = bias.at[0, CP:CP + cout].set(params["b_i"].reshape(cout))

    # BN affine params consolidated into a single (8, CP) block.
    bn_p = jnp.zeros((8, CP), jnp.float32)
    bn_p = bn_p.at[0, :cout].set(params["gamma_rr"].reshape(cout))
    bn_p = bn_p.at[1, :cout].set(params["gamma_ii"].reshape(cout))
    bn_p = bn_p.at[2, :cout].set(params["gamma_ri"].reshape(cout))
    bn_p = bn_p.at[3, :cout].set(params["beta_r"].reshape(cout))
    bn_p = bn_p.at[4, :cout].set(params["beta_i"].reshape(cout))

    # ---- pass 1: tiled GEMM + bias + global statistic sums (reduction) -----
    y, stats = pl.pallas_call(
        functools.partial(gemm_stats_kernel, tile_m=tile_m, cp=CP, m_valid=M),
        out_shape=(jax.ShapeDtypeStruct((MP, 2 * CP), jnp.float32),
                   jax.ShapeDtypeStruct((8, CP), jnp.float32)),
        grid=(n_tiles,),
        in_specs=[pl.BlockSpec((tile_m, 2 * KP), lambda i: (i, 0)),
                  pl.BlockSpec((2 * KP, 2 * CP), lambda i: (0, 0)),
                  pl.BlockSpec((8, 2 * CP), lambda i: (0, 0))],
        out_specs=(pl.BlockSpec((tile_m, 2 * CP), lambda i: (i, 0)),
                   pl.BlockSpec((8, CP), lambda i: (0, 0))),
        compiler_params=pltpu.CompilerParams(
            dimension_semantics=("arbitrary",)),
    )(a, w, bias)

    # ---- pass 2: normalize + affine + complex leaky relu (parallel tiles) --
    out = pl.pallas_call(
        functools.partial(bn_act_kernel, cp=CP, m_valid=M),
        out_shape=jax.ShapeDtypeStruct((MP, 2 * CP), jnp.float32),
        grid=(n_tiles,),
        in_specs=[pl.BlockSpec((tile_m, 2 * CP), lambda i: (i, 0)),
                  pl.BlockSpec((8, CP), lambda i: (0, 0)),
                  pl.BlockSpec((8, CP), lambda i: (0, 0))],
        out_specs=pl.BlockSpec((tile_m, 2 * CP), lambda i: (i, 0)),
        compiler_params=pltpu.CompilerParams(
            dimension_semantics=("parallel",)),
    )(y, stats, bn_p)

    # (MP, 2*CP) -> NHWC -> NCHW complex
    out_r = out[:M, :cout].reshape(N, H, W, cout).transpose(0, 3, 1, 2)
    out_i = out[:M, CP:CP + cout].reshape(N, H, W, cout).transpose(0, 3, 1, 2)
    return out_r + 1j * out_i


# ---------------------------------------------------------------------------
# Pure-JAX reference (independent of the kernels) for correctness check
# ---------------------------------------------------------------------------
def reference_forward(x, enc, params, *, kernel_size, padding, scale_factor=2):
    xr, xi = jnp.real(x).astype(jnp.float32), jnp.imag(x).astype(jnp.float32)
    er, ei = jnp.real(enc).astype(jnp.float32), jnp.imag(enc).astype(jnp.float32)

    def up(a):
        a = jnp.repeat(a, scale_factor, axis=2)
        return jnp.repeat(a, scale_factor, axis=3)

    catr = jnp.concatenate([up(xr), er], axis=1)
    cati = jnp.concatenate([up(xi), ei], axis=1)

    # weights [KH, KW, Cin, Cout] -> OIHW
    w_oihw_r = jnp.transpose(params["w_r"], (3, 2, 0, 1))
    w_oihw_i = jnp.transpose(params["w_i"], (3, 2, 0, 1))
    conv = functools.partial(
        lax.conv_general_dilated, window_strides=(1, 1),
        padding=[(padding, padding), (padding, padding)],
        dimension_numbers=("NCHW", "OIHW", "NCHW"),
        precision=lax.Precision.HIGHEST)

    br = params["b_r"].reshape(1, -1, 1, 1)
    bi = params["b_i"].reshape(1, -1, 1, 1)
    yr = conv(catr, w_oihw_r) - conv(cati, w_oihw_i) + br
    yi = conv(catr, w_oihw_i) + conv(cati, w_oihw_r) + bi

    eps = 1e-5
    ax = (0, 2, 3)
    mr = yr.mean(axis=ax, keepdims=True)
    mi = yi.mean(axis=ax, keepdims=True)
    xr_, xi_ = yr - mr, yi - mi
    crr = (xr_ * xr_).mean(axis=ax, keepdims=True) + eps
    cii = (xi_ * xi_).mean(axis=ax, keepdims=True) + eps
    cri = (xr_ * xi_).mean(axis=ax, keepdims=True)
    s = jnp.sqrt(crr * cii - cri * cri)
    t = jnp.sqrt(crr + cii + 2.0 * s)
    inv_st = 1.0 / (s * t)
    rrr, rii, rri = (cii + s) * inv_st, (crr + s) * inv_st, -cri * inv_st
    nr = rrr * xr_ + rri * xi_
    ni = rri * xr_ + rii * xi_
    grr = params["gamma_rr"].reshape(1, -1, 1, 1)
    gii = params["gamma_ii"].reshape(1, -1, 1, 1)
    gri = params["gamma_ri"].reshape(1, -1, 1, 1)
    betar = params["beta_r"].reshape(1, -1, 1, 1)
    betai = params["beta_i"].reshape(1, -1, 1, 1)
    zr = grr * nr + gri * ni + betar
    zi = gri * nr + gii * ni + betai
    slope = 0.2
    zr = jnp.where(zr >= 0.0, zr, slope * zr)
    zi = jnp.where(zi >= 0.0, zi, slope * zi)
    return zr + 1j * zi


# ---------------------------------------------------------------------------
# Deterministic parameter init + example run
# ---------------------------------------------------------------------------
def init_params(key, in_channels, out_channels, kernel_size):
    k_wr, k_wi, k_br, k_bi = jax.random.split(key, 4)
    fan_in = in_channels * kernel_size * kernel_size
    wscale = 1.0 / np.sqrt(fan_in)
    w_shape = (kernel_size, kernel_size, in_channels, out_channels)
    params = {
        "w_r": wscale * jax.random.normal(k_wr, w_shape, jnp.float32),
        "w_i": wscale * jax.random.normal(k_wi, w_shape, jnp.float32),
        "b_r": wscale * jax.random.normal(k_br, (1, out_channels), jnp.float32),
        "b_i": wscale * jax.random.normal(k_bi, (1, out_channels), jnp.float32),
        # ComplexBatchNorm2d default affine init: gamma_rr = gamma_ii = 1/sqrt(2),
        # gamma_ri = 0, beta = 0.
        "gamma_rr": jnp.full((1, out_channels), 1.0 / np.sqrt(2.0), jnp.float32),
        "gamma_ii": jnp.full((1, out_channels), 1.0 / np.sqrt(2.0), jnp.float32),
        "gamma_ri": jnp.zeros((1, out_channels), jnp.float32),
        "beta_r": jnp.zeros((1, out_channels), jnp.float32),
        "beta_i": jnp.zeros((1, out_channels), jnp.float32),
    }
    return params


if __name__ == "__main__":
    # Decoder gets a low-res feature map x and a skip connection enc.
    # conv in_channels = x_channels + enc_channels.
    batch = 2
    x_channels, enc_channels = 4, 4
    in_channels = x_channels + enc_channels      # 8
    out_channels = 4
    kernel_size, padding = 3, 1
    h_lo = w_lo = 16                             # x spatial; enc spatial = 32
    # M = batch * (2*h_lo) * (2*w_lo) = 2048  -> 4 grid tiles of 512 rows.

    key = jax.random.PRNGKey(0)
    kxr, kxi, ker, kei, kp = jax.random.split(key, 5)
    x = (jax.random.normal(kxr, (batch, x_channels, h_lo, w_lo), jnp.float32)
         + 1j * jax.random.normal(kxi, (batch, x_channels, h_lo, w_lo), jnp.float32)
         ).astype(jnp.complex64)
    enc = (jax.random.normal(ker, (batch, enc_channels, 2 * h_lo, 2 * w_lo), jnp.float32)
           + 1j * jax.random.normal(kei, (batch, enc_channels, 2 * h_lo, 2 * w_lo), jnp.float32)
           ).astype(jnp.complex64)
    params = init_params(kp, in_channels, out_channels, kernel_size)

    out = decoder_block_forward(x, enc, params,
                                kernel_size=kernel_size, padding=padding)
    out = jax.block_until_ready(out)

    ref = reference_forward(x, enc, params,
                            kernel_size=kernel_size, padding=padding)
    # bf16 GEMM inputs (f32 accumulation) -> slightly looser tolerance.
    np.testing.assert_allclose(np.asarray(jnp.real(out)), np.asarray(jnp.real(ref)),
                               rtol=2e-2, atol=2e-2)
    np.testing.assert_allclose(np.asarray(jnp.imag(out)), np.asarray(jnp.imag(ref)),
                               rtol=2e-2, atol=2e-2)
    assert out.shape == (batch, out_channels, 2 * h_lo, 2 * w_lo)
    assert out.dtype == jnp.complex64

    print("KERNEL_OK")
</pallas_src>

<mosaic_0001>
module attributes {stable_mosaic.version = 11 : i64} {
  func.func @gemm_stats_kernel(%arg0: i32, %arg1: memref<512x256xbf16, #tpu.memory_space<vmem>>, %arg2: memref<256x256xbf16, #tpu.memory_space<vmem>>, %arg3: memref<8x256xf32, #tpu.memory_space<vmem>>, %arg4: memref<512x256xf32, #tpu.memory_space<vmem>>, %arg5: memref<8x128xf32, #tpu.memory_space<vmem>>) attributes {dimension_semantics = [#tpu.dimension_semantics<arbitrary>], iteration_bounds = array<i64: 4>, scalar_prefetch = 0 : i64, scratch_operands = 0 : i64, tpu.core_type = #tpu.core_type<tc>, window_params = [{transform_indices = @transform_0, window_bounds = array<i64: 512, 256>}, {pipeline_mode = #tpu.pipeline_mode<synchronous>, transform_indices = @transform_1, window_bounds = array<i64: 256, 256>}, {pipeline_mode = #tpu.pipeline_mode<synchronous>, transform_indices = @transform_2, window_bounds = array<i64: 8, 256>}, {transform_indices = @transform_3, window_bounds = array<i64: 512, 256>}, {pipeline_mode = #tpu.pipeline_mode<synchronous>, transform_indices = @transform_4, window_bounds = array<i64: 8, 128>}]} {
    %c0 = arith.constant 0 : index
    %c0_0 = arith.constant 0 : index
    %0 = vector.load %arg1[%c0, %c0_0] : memref<512x256xbf16, #tpu.memory_space<vmem>>, vector<512x256xbf16>
    %c0_1 = arith.constant 0 : index
    %c0_2 = arith.constant 0 : index
    %1 = vector.load %arg2[%c0_1, %c0_2] : memref<256x256xbf16, #tpu.memory_space<vmem>>, vector<256x256xbf16>
    %cst = arith.constant dense<0.000000e+00> : vector<512x256xf32>
    %2 = tpu.matmul %0, %1, %cst {dimension_numbers = #tpu.dot_dimension_numbers<[1], [0], [0], [1], [0, 0, 1, 1], [], []>} : vector<512x256xbf16>, vector<256x256xbf16>, vector<512x256xf32> -> vector<512x256xf32>
    %c0_3 = arith.constant 0 : index
    %c0_4 = arith.constant 0 : index
    %3 = vector.load %arg3[%c0_3, %c0_4] : memref<8x256xf32, #tpu.memory_space<vmem>>, vector<1x256xf32>
    %4 = vector.broadcast %3 : vector<1x256xf32> to vector<512x256xf32>
    %5 = arith.addf %2, %4 : vector<512x256xf32>
    %c0_5 = arith.constant 0 : index
    %c0_6 = arith.constant 0 : index
    %6 = vector.load %arg4[%c0_5, %c0_6] : memref<512x256xf32, #tpu.memory_space<vmem>>, vector<512x256xf32>
    tpu.vector_store %arg4[%c0_5, %c0_6], %5 {strides = array<i32>} : memref<512x256xf32, #tpu.memory_space<vmem>>, vector<512x256xf32>,
    %7 = vector.extract_strided_slice %5 {offsets = [0, 0], sizes = [512, 128], strides = [1, 1]} : vector<512x256xf32> to vector<512x128xf32>
    %8 = vector.extract_strided_slice %5 {offsets = [0, 128], sizes = [512, 128], strides = [1, 1]} : vector<512x256xf32> to vector<512x128xf32>
    %cst_7 = arith.constant dense<0.000000e+00> : vector<128xf32>
    %9 = vector.multi_reduction <add>, %7, %cst_7 [0] : vector<512x128xf32> to vector<128xf32>
    %10 = vector.shape_cast %9 : vector<128xf32> to vector<1x128xf32>
    %cst_8 = arith.constant dense<0.000000e+00> : vector<128xf32>
    %11 = vector.multi_reduction <add>, %8, %cst_8 [0] : vector<512x128xf32> to vector<128xf32>
    %12 = vector.shape_cast %11 : vector<128xf32> to vector<1x128xf32>
    %13 = arith.mulf %7, %7 : vector<512x128xf32>
    %cst_9 = arith.constant dense<0.000000e+00> : vector<128xf32>
    %14 = vector.multi_reduction <add>, %13, %cst_9 [0] : vector<512x128xf32> to vector<128xf32>
    %15 = vector.shape_cast %14 : vector<128xf32> to vector<1x128xf32>
    %16 = arith.mulf %8, %8 : vector<512x128xf32>
    %cst_10 = arith.constant dense<0.000000e+00> : vector<128xf32>
    %17 = vector.multi_reduction <add>, %16, %cst_10 [0] : vector<512x128xf32> to vector<128xf32>
    %18 = vector.shape_cast %17 : vector<128xf32> to vector<1x128xf32>
    %19 = arith.mulf %7, %8 : vector<512x128xf32>
    %cst_11 = arith.constant dense<0.000000e+00> : vector<128xf32>
    %20 = vector.multi_reduction <add>, %19, %cst_11 [0] : vector<512x128xf32> to vector<128xf32>
    %21 = vector.shape_cast %20 : vector<128xf32> to vector<1x128xf32>
    %cst_12 = arith.constant 0.000000e+00 : f32
    %22 = vector.broadcast %cst_12 : f32 to vector<1x128xf32>
    %23 = tpu.concatenate %10, %12, %15, %18, %21, %22, %22, %22 in 0 : vector<1x128xf32>, vector<1x128xf32>, vector<1x128xf32>, vector<1x128xf32>, vector<1x128xf32>, vector<1x128xf32>, vector<1x128xf32>, vector<1x128xf32> -> vector<8x128xf32>
    %c0_i32 = arith.constant 0 : i32
    %24 = arith.cmpi eq, %arg0, %c0_i32 : i32
    %25 = arith.extui %24 : i1 to i32
    %c0_i32_13 = arith.constant 0 : i32
    %26 = arith.cmpi ne, %25, %c0_i32_13 : i32
    scf.if %26 {
      %cst_18 = arith.constant 0.000000e+00 : f32
      %30 = vector.broadcast %cst_18 : f32 to vector<8x128xf32>
      %c0_19 = arith.constant 0 : index
      %c0_20 = arith.constant 0 : index
      %31 = vector.load %arg5[%c0_19, %c0_20] : memref<8x128xf32, #tpu.memory_space<vmem>>, vector<8x128xf32>
      tpu.vector_store %arg5[%c0_19, %c0_20], %30 {strides = array<i32>} : memref<8x128xf32, #tpu.memory_space<vmem>>, vector<8x128xf32>,
    } else {
    }
    %c0_14 = arith.constant 0 : index
    %c0_15 = arith.constant 0 : index
    %27 = vector.load %arg5[%c0_14, %c0_15] : memref<8x128xf32, #tpu.memory_space<vmem>>, vector<8x128xf32>
    %28 = arith.addf %27, %23 : vector<8x128xf32>
    %c0_16 = arith.constant 0 : index
    %c0_17 = arith.constant 0 : index
    %29 = vector.load %arg5[%c0_16, %c0_17] : memref<8x128xf32, #tpu.memory_space<vmem>>, vector<8x128xf32>
    tpu.vector_store %arg5[%c0_16, %c0_17], %28 {strides = array<i32>} : memref<8x128xf32, #tpu.memory_space<vmem>>, vector<8x128xf32>,
    return
  }
  func.func @transform_0(%arg0: i32) -> (i32, i32) {
    %c0_i32 = arith.constant 0 : i32
    %c0_i32_0 = arith.constant 0 : i32
    return %arg0, %c0_i32 : i32, i32
  }
  func.func @transform_1(%arg0: i32) -> (i32, i32) {
    %c0_i32 = arith.constant 0 : i32
    %c0_i32_0 = arith.constant 0 : i32
    %c0_i32_1 = arith.constant 0 : i32
    return %c0_i32, %c0_i32_0 : i32, i32
  }
  func.func @transform_2(%arg0: i32) -> (i32, i32) {
    %c0_i32 = arith.constant 0 : i32
    %c0_i32_0 = arith.constant 0 : i32
    %c0_i32_1 = arith.constant 0 : i32
    return %c0_i32, %c0_i32_0 : i32, i32
  }
  func.func @transform_3(%arg0: i32) -> (i32, i32) {
    %c0_i32 = arith.constant 0 : i32
    %c0_i32_0 = arith.constant 0 : i32
    return %arg0, %c0_i32 : i32, i32
  }
  func.func @transform_4(%arg0: i32) -> (i32, i32) {
    %c0_i32 = arith.constant 0 : i32
    %c0_i32_0 = arith.constant 0 : i32
    %c0_i32_1 = arith.constant 0 : i32
    return %c0_i32, %c0_i32_0 : i32, i32
  }
}

</mosaic_0001>

<bundles_post_ra>
// kernel: tpu_custom_call.1
= control target key start
LH: loop header
LB: loop body
LE: loop exit
PB: predicated region body
PF: predicated region fallthrough
CT: control target
= control target key end

     0   :  { %10 = vsyncpa [#allocation3], 0  ;;  %s3556_s0 = inlined_call_operand.hbm [shape: bf16[2048,256], index: 0, kind: input, shape index: {}]   ;;  %s3557_s1 = inlined_call_operand.hbm [shape: bf16[256,256], index: 1, kind: input, shape index: {}]   ;;  %s3558_s2 = inlined_call_operand.hbm [shape: f32[8,256], index: 2, kind: input, shape index: {}]   ;;  %s3559_s3 = inlined_call_operand.hbm [shape: f32[2048,256], index: 3, kind: output, shape index: {0}]   ;;  %s3560_s4 = inlined_call_operand.hbm [shape: f32[8,128], index: 4, kind: output, shape index: {1}]  }
   0x1   :  { %12 = vsyncpa [#allocation3 + $0x1], 0 }
   0x2   :  { %13 = vsyncpa [#allocation6], 0 }
   0x3   :  { %14 = vsyncpa [#allocation4], 0 }
   0x4   :  { %16 = vsyncpa [#allocation4 + $0x1], 0 }
   0x5   :  { %17 = vsyncpa [#allocation10], 0  ;;  %s2622_s15 = smov 0   ;;  %s2624_s16 = smov 0  }
   0x6   :  { %s2626_s17 = smov 0   ;;  %s2628_s18 = smov 0  }
   0x7 LB: > { %s2643_s19 = sadd.s32 4294967295, %s2585_s18   ;;  %s2002_s20 = sadd.s32 4294967294, %s2585_s18   ;;  %s2585_s18 = sphi %s2628_s18, %s3647_s18   ;;  %s2581_s17 = sphi %s2626_s17, %s3646_s17   ;;  %s2577_s16 = sphi %s2624_s16, %s3645_s16   ;;  %s2573_s15 = sphi %s2622_s15, %s3644_s15  }
   0x8   : > { %p43_p0 = scmp.ne.s32.totalorder %s2577_s16, %s2573_s15  ;;  %p3561_p1 = scmp.eq.s32.totalorder %s2643_s19, 0 }
   0x9   : > { %p115_p3 = scmp.eq.s32.totalorder %s2002_s20, 3  ;;  %p2003_p5 = scmp.ge.s32.totalorder %s2585_s18, 1 }
   0xa   : > { %p2652_p4 = por %p3561_p1, %p43_p0  ;;  %p143_p7 = scmp.lt.s32.totalorder %s2585_s18, 5 }
   0xb   : > { %p2657_p6 = por %p115_p3, %p43_p0  ;;  %s2587_s24 = smov [#allocation5]  }
   0xc   : > { %s3594_s21 = scalar_select %p2652_p4, 1, 0 }
   0xd   : > { %s3595_s22 = scalar_select %p2657_p6, 1, 0 }
   0xe   : > { %p2663_p9 = pnand %p2003_p5, %p143_p7  ;;  %s155_s25 = sshll.u32 %s2587_s24, 4  ;;  %s156_s25 = int_to_ptr.vmem [resolvable:$true] %s155_s25 }
   0xf   : > { %s2588_s27 = smov [#allocation7]   ;;  %s2399_s5 = scalar_lea.hbm %s3557_s1, 4096 }
  0x10   : > { %s3596_s23 = scalar_select %p2663_p9, 1, 0 }
  0x11   : > { %p2173_p10 = pneg %p2663_p9  ;;  %s169_s28 = sshll.u32 %s2588_s27, 4  ;;  %s2675_s28 = int_to_ptr.vmem [resolvable:$true] %s169_s28 }
  0x12   : > { %p2400_p12 = scmp.ne.s32.totalorder %s3557_s1, %s2399_s5  ;;  %p2406_p5 = scmp.lt.u32.totalorder %s2399_s5, %s3557_s1 }
  0x13   : > { %p2671_p11 = pnand %p2173_p10, %p3561_p1 }
  0x15   : > { %p2401_p13 = pneg %p2671_p11 }
  0x17   : > { %p2402_p0 = pnand %p2401_p13, %p2400_p12 }
  0x19   : > { %p2403_p3 = pneg %p2402_p0 }
  0x1b   : > { %p2408_p7 = pnand %p2406_p5, %p2403_p3 }
  0x1d   : > { %2411 = shalt.err (!%p2408_p7)
}
  0x1e   : > { %s2412_s10 = scalar_lea.vmem %s156_s25, 4096  ;;  %p2420_p2 = scmp.lt.s32.totalorder %s156_s25, %s156_s25 }
  0x1f   : > { %p2413_p10 = scmp.ne.s32.totalorder %s156_s25, %s2412_s10  ;;  %p2421_p6 = scmp.lt.s32.totalorder %s2412_s10, %s2412_s10 }
  0x21   : > { %p2415_p8 = pnand %p2413_p10, %p2401_p13  ;;  %p2422_p4 = por %p2421_p6, %p2420_p2 }
  0x23   : > { %p2416_p1 = pneg %p2415_p8 }
  0x25   : > { %p2423_p9 = pnand %p2422_p4, %p2416_p1 }
  0x27   : > { %2426 = shalt.err (!%p2423_p9)
}
  0x28   : > { %s2589_s11 = smov 128   ;;  %s2590_s12 = smov 8  }
  0x29   : > { %2176 = dma.hbm_to_vmem [thread:$0]  (!%p2671_p11), %s3557_s1, 4096, %s156_s25, [#allocation6], %s2589_s11, %s2589_s11, %s2590_s12  }
  0x2a   : > { %s2427_s27 = scalar_lea.hbm %s3558_s2, 256 }
  0x2b   : > { %p2428_p1 = scmp.ne.s32.totalorder %s3558_s2, %s2427_s27  ;;  %p2434_p6 = scmp.lt.u32.totalorder %s2427_s27, %s3558_s2 }
  0x2d   : > { %p2430_p2 = pnand %p2428_p1, %p2401_p13 }
  0x2f   : > { %p2431_p4 = pneg %p2430_p2 }
  0x31   : > { %p2436_p8 = pnand %p2434_p6, %p2431_p4 }
  0x33   : > { %2439 = shalt.err (!%p2436_p8)
}
  0x34   : > { %s2440_s25 = scalar_lea.vmem %s2675_s28, 256  ;;  %p2448_p3 = scmp.lt.s32.totalorder %s2675_s28, %s2675_s28 }
  0x35   : > { %p2441_p9 = scmp.ne.s32.totalorder %s2675_s28, %s2440_s25  ;;  %p2449_p5 = scmp.lt.s32.totalorder %s2440_s25, %s2440_s25 }
  0x37   : > { %p2443_p12 = pnand %p2441_p9, %p2401_p13  ;;  %p2450_p7 = por %p2449_p5, %p2448_p3 }
  0x39   : > { %p2444_p0 = pneg %p2443_p12 }
  0x3b   : > { %p2451_p10 = pnand %p2450_p7, %p2444_p0 }
  0x3d   : > { %2454 = shalt.err (!%p2451_p10)
}
  0x3e   : > { %2179 = dma.hbm_to_vmem [thread:$0]  (!%p2671_p11), %s3558_s2, 256, %s2675_s28, [#allocation6]  }
  0x3f   : > { %s2728_s9 = sadd.s32 1, %s2585_s18   ;;  %s30_s26 = sadd.s32 1, %s2581_s17 }
  0x40   : > { %s27_s10 = ssub.s32 %s2585_s18, %s2728_s9  ;;  %p37_p13 = scmp.ne.s32.totalorder %s2581_s17, %s2577_s16 }
  0x41   : > { %p28_p1 = scmp.eq.s32.totalorder %s27_s10, 0  ;;  %p38_p2 = scmp.eq.s32.totalorder %s2585_s18, 0 }
  0x42   : > { %p3598_p4 = scmp.eq.s32.totalorder %s2643_s19, 3  ;;  %p2190_p8 = scmp.lt.s32.totalorder %s2585_s18, 4 }
  0x43   : > { %s2744_s14 = scalar_select %p28_p1, %s2581_s17, %s30_s26  }
  0x44   : > { %p2738_p6 = por %p3598_p4, %p37_p13  ;;  %p39_p9 = por %p38_p2, %p37_p13 }
  0x45   : > { %s180_s20 = sand.u32 1, %s2581_s17   ;;  %s2122_s28 = sshll.u32 %s2585_s18, 13 }
  0x46   : > { %s2007_s24 = sshll.u32 %s180_s20, 9  ;;  %s2751_s30 = scalar_lea.hbm %s3556_s0, %s2122_s28 }
  0x47   : > { %s184_s5 = scalar_lea.vmem [#allocation2], %s2007_s24  ;;  %p2755_p11 = pnand %p2190_p8, %p39_p9 }
  0x48   : > { %s192_s6 = sshll.u32 %s184_s5, 4  ;;  %s2759_s7 = scalar_lea.sflag [#allocation3], %s180_s20  ;;  %s2753_s6 = int_to_ptr.vmem [resolvable:$true] %s192_s6 }
  0x49   : > { %s2455_s8 = scalar_lea.hbm %s2751_s30, 8192  ;;  %p2457_p0 = pneg %p2755_p11 }
  0x4a   : > { %p2456_p12 = scmp.ne.s32.totalorder %s2751_s30, %s2455_s8  ;;  %s2460_s24 = scalar_lea.hbm %s3556_s0, 32768 }
  0x4b   : > { %p2461_p7 = scmp.lt.u32.totalorder %s2751_s30, %s3556_s0  ;;  %p2462_p10 = scmp.lt.u32.totalorder %s2460_s24, %s2455_s8 }
  0x4c   : > { %p2458_p3 = pnand %p2457_p0, %p2456_p12  ;;  %p2464_p1 = scmp.lt.u32.totalorder %s2455_s8, %s2751_s30 }
  0x4d   : > { %p2463_p13 = por %p2462_p10, %p2461_p7 }
  0x4e   : > { %p2459_p5 = pneg %p2458_p3 }
  0x4f   : > { %p2465_p2 = por %p2464_p1, %p2463_p13 }
  0x51   : > { %p2466_p4 = pnand %p2465_p2, %p2459_p5 }
  0x53   : > { %2469 = shalt.err (!%p2466_p4)
}
  0x54   : > { %s2470_s20 = scalar_lea.vmem %s2753_s6, 8192  ;;  %s2591_s29 = smov [#allocation2]  }
  0x55   : > { %p2471_p8 = scmp.ne.s32.totalorder %s2753_s6, %s2470_s20  ;;  %s2475_s5 = sshll.u32 %s2591_s29, 4  ;;  %s2476_s5 = int_to_ptr.vmem [resolvable:$false] %s2475_s5 }
  0x56   : > { %s2477_s26 = scalar_lea.vmem %s2476_s5, 16384  ;;  %p2478_p3 = scmp.lt.s32.totalorder %s2753_s6, %s2476_s5 }
  0x57   : > { %p2473_p9 = pnand %p2471_p8, %p2457_p0  ;;  %p2479_p7 = scmp.lt.s32.totalorder %s2477_s26, %s2470_s20 }
  0x59   : > { %p2474_p12 = pneg %p2473_p9  ;;  %p2480_p10 = por %p2479_p7, %p2478_p3 }
  0x5b   : > { %p2481_p13 = pnand %p2480_p10, %p2474_p12 }
  0x5d   : > { %2484 = shalt.err (!%p2481_p13)
}
  0x5e   : > { %2183 = dma.hbm_to_vmem [thread:$0]  (!%p2755_p11), %s2751_s30, 8192, %s2753_s6, %s2759_s7, %s2589_s11, %s2589_s11, %s2590_s12  }
  0x5f   : > { %p3601_p0 = scmp.ne.s32.totalorder %s3596_s23, 0 }
  0x61   : > { %204 = sbr.rel (%p3601_p0) target bundleno = 652 (0x28c), region = 32 }
  0x68   : > { %s2793_s8 = sand.u32 1, %s2577_s16   ;;  %p3602_p5 = scmp.ne.s32.totalorder %s3594_s21, 0 }
  0x69   : > { %s2012_s10 = sshll.u32 %s2793_s8, 9  ;;  %s207_s24 = scalar_lea.sflag [#allocation3], %s2793_s8 }
  0x6a   : > { %s2797_s28 = scalar_lea.vmem [#allocation2], %s2012_s10 }
  0x6b   : > { %2556 = dma.done.wait (%p3602_p5), %s207_s24, 8192  }
  0x6c   : > { %2558 = vsyncadd (%p3602_p5), %s207_s24, 4294959104  ;;  %p3603_p11 = scmp.eq.s32.totalorder %s2643_s19, 0 }
  0x6e   : > { %2560 = dma.done.wait (%p3603_p11), [#allocation6], 4352   ;;  %p3604_p1 = pmov %p3603_p11 }
  0x6f   : > { %v2236_v0 = vld [vmem:[#allocation5 + $0x4] ss:$8 sps:$4 sm:$0xff]   ;;  %v2238_v1 = vld [vmem:[#allocation5] ss:$8 sps:$4 sm:$0xff]   ;;  %v2239_v2 = vld [vmem:[#allocation5 + $0x14] ss:$8 sps:$4 sm:$0xff]  }
  0x70   : > { %2562 = vsyncadd (%p3604_p1), [#allocation6], 4294962944  ;;  %833 = vmatprep.subr.bf16.mxu0 %v2236_v0  ;;  %2125 = vmatprep.subr.bf16.mxu1 %v2236_v0  ;;  %v2241_v3 = vld [vmem:[#allocation5 + $0x10] ss:$8 sps:$4 sm:$0xff]   ;;  %v2242_v4 = vld [vmem:[#allocation5 + $0x24] ss:$8 sps:$4 sm:$0xff]  }
  0x71   : > { %834 = vmatpush1.bf16.msra.mxu0 %v2238_v1  ;;  %2141 = vmatpush1.bf16.msra.mxu1 %v2238_v1  ;;  %v2244_v5 = vld [vmem:[#allocation5 + $0x20] ss:$8 sps:$4 sm:$0xff]   ;;  %v2245_v6 = vld [vmem:[#allocation5 + $0x34] ss:$8 sps:$4 sm:$0xff]   ;;  %v2247_v7 = vld [vmem:[#allocation5 + $0x30] ss:$8 sps:$4 sm:$0xff]  }
  0x72   : > { %835 = vmatprep.subr.bf16.mxu0 %v2239_v2  ;;  %2126 = vmatprep.subr.bf16.mxu1 %v2239_v2  ;;  %v2248_v8 = vld [vmem:[#allocation5 + $0x44] ss:$8 sps:$4 sm:$0xff]   ;;  %v2250_v9 = vld [vmem:[#allocation5 + $0x40] ss:$8 sps:$4 sm:$0xff]   ;;  %v2251_v10 = vld [vmem:[#allocation5 + $0x54] ss:$8 sps:$4 sm:$0xff]  }
  0x73   : > { %v2253_v11 = vld [vmem:[#allocation5 + $0x50] ss:$8 sps:$4 sm:$0xff]   ;;  %v2254_v12 = vld [vmem:[#allocation5 + $0x64] ss:$8 sps:$4 sm:$0xff]   ;;  %v2256_v14 = vld [vmem:[#allocation5 + $0x60] ss:$8 sps:$4 sm:$0xff]  }
  0x74   : > { %v2286_v13 = vld [vmem:[%s2797_s28 + $0x4] ss:$8 sps:$4 sm:$0xff]   ;;  %v2257_v15 = vld [vmem:[#allocation5 + $0x74] ss:$8 sps:$4 sm:$0xff]   ;;  %v2259_v16 = vld [vmem:[#allocation5 + $0x70] ss:$8 sps:$4 sm:$0xff]  }
  0x75   : > { %836 = vmatpush1.bf16.msra.mxu0 %v2241_v3  ;;  %2142 = vmatpush1.bf16.msra.mxu1 %v2241_v3  ;;  %v2260_v17 = vld [vmem:[#allocation5 + $0x84] ss:$8 sps:$4 sm:$0xff]   ;;  %v2262_v18 = vld [vmem:[#allocation5 + $0x80] ss:$8 sps:$4 sm:$0xff]   ;;  %v2263_v19 = vld [vmem:[#allocation5 + $0x94] ss:$8 sps:$4 sm:$0xff]  }
  0x76   : > { %837 = vmatprep.subr.bf16.mxu0 %v2242_v4  ;;  %2127 = vmatprep.subr.bf16.mxu1 %v2242_v4  ;;  %v2310_v20 = vld [vmem:[%s2797_s28 + $0x104] ss:$8 sps:$4 sm:$0xff]   ;;  %v2265_v21 = vld [vmem:[#allocation5 + $0x90] ss:$8 sps:$4 sm:$0xff]   ;;  %v2268_v23 = vld [vmem:[#allocation5 + $0xa0] ss:$8 sps:$4 sm:$0xff]  }
  0x77   : > { %865 = vmatprep.mubr.bf16.mxu0 %v2286_v13  ;;  %v2266_v22 = vld [vmem:[#allocation5 + $0xa4] ss:$8 sps:$4 sm:$0xff]   ;;  %1025 = vmatprep.mubr.bf16.mxu1 %v2310_v20  ;;  %v2269_v24 = vld [vmem:[#allocation5 + $0xb4] ss:$8 sps:$4 sm:$0xff]   ;;  %v2271_v25 = vld [vmem:[#allocation5 + $0xb0] ss:$8 sps:$4 sm:$0xff]  }
  0x78   : > { %v2272_v26 = vld [vmem:[#allocation5 + $0xc4] ss:$8 sps:$4 sm:$0xff]   ;;  %v2274_v27 = vld [vmem:[#allocation5 + $0xc0] ss:$8 sps:$4 sm:$0xff]   ;;  %v2275_v28 = vld [vmem:[#allocation5 + $0xd4] ss:$8 sps:$4 sm:$0xff]  }
  0x79   : > { %838 = vmatpush1.bf16.msra.mxu0 %v2244_v5  ;;  %2143 = vmatpush1.bf16.msra.mxu1 %v2244_v5  ;;  %v2277_v29 = vld [vmem:[#allocation5 + $0xd0] ss:$8 sps:$4 sm:$0xff]   ;;  %v2278_v30 = vld [vmem:[#allocation5 + $0xe4] ss:$8 sps:$4 sm:$0xff]   ;;  %v2280_v31 = vld [vmem:[#allocation5 + $0xe0] ss:$8 sps:$4 sm:$0xff]  }
  0x7a   : > { %839 = vmatprep.subr.bf16.mxu0 %v2245_v6  ;;  %2128 = vmatprep.subr.bf16.mxu1 %v2245_v6  ;;  %v2281_v32 = vld [vmem:[#allocation5 + $0xf4] ss:$8 sps:$4 sm:$0xff]   ;;  %v2283_v33 = vld [vmem:[#allocation5 + $0xf0] ss:$8 sps:$4 sm:$0xff]   ;;  %v2284_v34 = vld [vmem:[%s2797_s28] ss:$8 sps:$4 sm:$0xff]  }
  0x7b   : > { %v2308_v35 = vld [vmem:[%s2797_s28 + $0x100] ss:$8 sps:$4 sm:$0xff]   ;;  %v2287_v36 = vld [vmem:[%s2797_s28 + $0x14] ss:$8 sps:$4 sm:$0xff]   ;;  %v2289_v38 = vld [vmem:[%s2797_s28 + $0x10] ss:$8 sps:$4 sm:$0xff]  }
  0x7c   : > { %v2314_v37 = vld [vmem:[%s2797_s28 + $0x114] ss:$8 sps:$4 sm:$0xff]   ;;  %v2316_v39 = vld [vmem:[%s2797_s28 + $0x110] ss:$8 sps:$4 sm:$0xff]   ;;  %v2290_v40 = vld [vmem:[%s2797_s28 + $0x24] ss:$8 sps:$4 sm:$0xff]  }
  0x7d   : > { %840 = vmatpush1.bf16.msra.mxu0 %v2247_v7  ;;  %2144 = vmatpush1.bf16.msra.mxu1 %v2247_v7  ;;  %v2320_v41 = vld [vmem:[%s2797_s28 + $0x124] ss:$8 sps:$4 sm:$0xff]   ;;  %v2292_v42 = vld [vmem:[%s2797_s28 + $0x20] ss:$8 sps:$4 sm:$0xff]   ;;  %v2293_v44 = vld [vmem:[%s2797_s28 + $0x34] ss:$8 sps:$4 sm:$0xff]  }
  0x7e   : > { %841 = vmatprep.subr.bf16.mxu0 %v2248_v8  ;;  %2129 = vmatprep.subr.bf16.mxu1 %v2248_v8  ;;  %v2322_v43 = vld [vmem:[%s2797_s28 + $0x120] ss:$8 sps:$4 sm:$0xff]   ;;  %v2326_v45 = vld [vmem:[%s2797_s28 + $0x134] ss:$8 sps:$4 sm:$0xff]   ;;  %v2295_v46 = vld [vmem:[%s2797_s28 + $0x30] ss:$8 sps:$4 sm:$0xff]  }
  0x7f   : > { %v2328_v47 = vld [vmem:[%s2797_s28 + $0x130] ss:$8 sps:$4 sm:$0xff]   ;;  %v2296_v48 = vld [vmem:[%s2797_s28 + $0x44] ss:$8 sps:$4 sm:$0xff]   ;;  %v2298_v50 = vld [vmem:[%s2797_s28 + $0x40] ss:$8 sps:$4 sm:$0xff]  }
  0x80   : > { %v2332_v49 = vld [vmem:[%s2797_s28 + $0x144] ss:$8 sps:$4 sm:$0xff]   ;;  %v2334_v51 = vld [vmem:[%s2797_s28 + $0x140] ss:$8 sps:$4 sm:$0xff]   ;;  %v2299_v52 = vld [vmem:[%s2797_s28 + $0x54] ss:$8 sps:$4 sm:$0xff]  }
  0x81   : > { %842 = vmatpush1.bf16.msra.mxu0 %v2250_v9  ;;  %2145 = vmatpush1.bf16.msra.mxu1 %v2250_v9  ;;  %v2338_v53 = vld [vmem:[%s2797_s28 + $0x154] ss:$8 sps:$4 sm:$0xff]   ;;  %v2301_v54 = vld [vmem:[%s2797_s28 + $0x50] ss:$8 sps:$4 sm:$0xff]   ;;  %v2302_v56 = vld [vmem:[%s2797_s28 + $0x64] ss:$8 sps:$4 sm:$0xff]  }
  0x82   : > { %843 = vmatprep.subr.bf16.mxu0 %v2251_v10  ;;  %2130 = vmatprep.subr.bf16.mxu1 %v2251_v10  ;;  %v2340_v55 = vld [vmem:[%s2797_s28 + $0x150] ss:$8 sps:$4 sm:$0xff]   ;;  %v2344_v57 = vld [vmem:[%s2797_s28 + $0x164] ss:$8 sps:$4 sm:$0xff]   ;;  %v2304_v58 = vld [vmem:[%s2797_s28 + $0x60] ss:$8 sps:$4 sm:$0xff]  }
  0x83   : > { %v2346_v59 = vld [vmem:[%s2797_s28 + $0x160] ss:$8 sps:$4 sm:$0xff]   ;;  %v2305_v60 = vld [vmem:[%s2797_s28 + $0x74] ss:$8 sps:$4 sm:$0xff]   ;;  %v2307_v62 = vld [vmem:[%s2797_s28 + $0x70] ss:$8 sps:$4 sm:$0xff]  }
  0x84   : > { %v2350_v61 = vld [vmem:[%s2797_s28 + $0x174] ss:$8 sps:$4 sm:$0xff]   ;;  %v2352_v63 = vld [vmem:[%s2797_s28 + $0x170] ss:$8 sps:$4 sm:$0xff]   ;;  %v2311_v0 = vld [vmem:[%s2797_s28 + $0x84] ss:$8 sps:$4 sm:$0xff]  }
  0x85   : > { %844 = vmatpush1.bf16.msra.mxu0 %v2253_v11  ;;  %2146 = vmatpush1.bf16.msra.mxu1 %v2253_v11  ;;  %v2356_v1 = vld [vmem:[%s2797_s28 + $0x184] ss:$8 sps:$4 sm:$0xff]   ;;  %v2313_v2 = vld [vmem:[%s2797_s28 + $0x80] ss:$8 sps:$4 sm:$0xff]   ;;  %v2317_v4 = vld [vmem:[%s2797_s28 + $0x94] ss:$8 sps:$4 sm:$0xff]  }
  0x86   : > { %845 = vmatprep.subr.bf16.mxu0 %v2254_v12  ;;  %2131 = vmatprep.subr.bf16.mxu1 %v2254_v12  ;;  %v2358_v3 = vld [vmem:[%s2797_s28 + $0x180] ss:$8 sps:$4 sm:$0xff]   ;;  %v2359_v5 = vld [vmem:[%s2797_s28 + $0x194] ss:$8 sps:$4 sm:$0xff]   ;;  %v2319_v6 = vld [vmem:[%s2797_s28 + $0x90] ss:$8 sps:$4 sm:$0xff]  }
  0x87   : > { %v2361_v7 = vld [vmem:[%s2797_s28 + $0x190] ss:$8 sps:$4 sm:$0xff]   ;;  %v2323_v8 = vld [vmem:[%s2797_s28 + $0xa4] ss:$8 sps:$4 sm:$0xff]   ;;  %v2325_v10 = vld [vmem:[%s2797_s28 + $0xa0] ss:$8 sps:$4 sm:$0xff]  }
  0x88   : > { %v2362_v9 = vld [vmem:[%s2797_s28 + $0x1a4] ss:$8 sps:$4 sm:$0xff]   ;;  %v2364_v11 = vld [vmem:[%s2797_s28 + $0x1a0] ss:$8 sps:$4 sm:$0xff]   ;;  %v2329_v12 = vld [vmem:[%s2797_s28 + $0xb4] ss:$8 sps:$4 sm:$0xff]  }
  0x89   : > { %846 = vmatpush1.bf16.msra.mxu0 %v2256_v14  ;;  %2147 = vmatpush1.bf16.msra.mxu1 %v2256_v14  ;;  %v2365_v13 = vld [vmem:[%s2797_s28 + $0x1b4] ss:$8 sps:$4 sm:$0xff]   ;;  %v2331_v14 = vld [vmem:[%s2797_s28 + $0xb0] ss:$8 sps:$4 sm:$0xff]   ;;  %s2015_s21 = sshll.u32 %s2793_s8, 10  ;;  %vm1851_vm0 = vcmask 1040384  }
  0x8a   : > { %847 = vmatprep.subr.bf16.mxu0 %v2257_v15  ;;  %2132 = vmatprep.subr.bf16.mxu1 %v2257_v15  ;;  %v2367_v15 = vld [vmem:[%s2797_s28 + $0x1b0] ss:$8 sps:$4 sm:$0xff]   ;;  %v2341_v20 = vld [vmem:[%s2797_s28 + $0xd4] ss:$8 sps:$4 sm:$0xff]   ;;  %s2880_s23 = scalar_lea.vmem [#allocation8], %s2015_s21  ;;  %vm1853_vm1 = vcmask 1041408  }
  0x8b   : > { %vm1855_vm2 = vcmask 1042432   ;;  %vm1857_vm3 = vcmask 1043456   ;;  %vm1859_vm4 = vcmask 1044480   ;;  %vm1861_vm5 = vcmask 1045504   ;;  %p3637_p2 = scmp.ne.s32.totalorder %s2643_s19, 0 }
  0x8c   : > { %vm1863_vm6 = vcmask 1046528  }
  0x8d   : > { %848 = vmatpush1.bf16.msra.mxu0 %v2259_v16  ;;  %2148 = vmatpush1.bf16.msra.mxu1 %v2259_v16  ;;  %v2335_v16 = vld [vmem:[%s2797_s28 + $0xc4] ss:$8 sps:$4 sm:$0xff]  }
  0x8e   : > { %849 = vmatprep.subr.bf16.mxu0 %v2260_v17  ;;  %2133 = vmatprep.subr.bf16.mxu1 %v2260_v17  ;;  %v2368_v17 = vld [vmem:[%s2797_s28 + $0x1c4] ss:$8 sps:$4 sm:$0xff]  }
  0x91   : > { %850 = vmatpush1.bf16.msra.mxu0 %v2262_v18  ;;  %2149 = vmatpush1.bf16.msra.mxu1 %v2262_v18  ;;  %v2337_v18 = vld [vmem:[%s2797_s28 + $0xc0] ss:$8 sps:$4 sm:$0xff]  }
  0x92   : > { %851 = vmatprep.subr.bf16.mxu0 %v2263_v19  ;;  %2134 = vmatprep.subr.bf16.mxu1 %v2263_v19  ;;  %v2370_v19 = vld [vmem:[%s2797_s28 + $0x1c0] ss:$8 sps:$4 sm:$0xff]  }
  0x95   : > { %852 = vmatpush1.bf16.msra.mxu0 %v2265_v21  ;;  %2150 = vmatpush1.bf16.msra.mxu1 %v2265_v21  ;;  %v2371_v21 = vld [vmem:[%s2797_s28 + $0x1d4] ss:$8 sps:$4 sm:$0xff]  }
  0x96   : > { %853 = vmatprep.subr.bf16.mxu0 %v2266_v22  ;;  %2135 = vmatprep.subr.bf16.mxu1 %v2266_v22  ;;  %v2343_v22 = vld [vmem:[%s2797_s28 + $0xd0] ss:$8 sps:$4 sm:$0xff]  }
  0x99   : > { %854 = vmatpush1.bf16.msra.mxu0 %v2268_v23  ;;  %2151 = vmatpush1.bf16.msra.mxu1 %v2268_v23  ;;  %v2373_v23 = vld [vmem:[%s2797_s28 + $0x1d0] ss:$8 sps:$4 sm:$0xff]  }
  0x9a   : > { %855 = vmatprep.subr.bf16.mxu0 %v2269_v24  ;;  %2136 = vmatprep.subr.bf16.mxu1 %v2269_v24  ;;  %v2347_v24 = vld [vmem:[%s2797_s28 + $0xe4] ss:$8 sps:$4 sm:$0xff]  }
  0x9d   : > { %856 = vmatpush1.bf16.msra.mxu0 %v2271_v25  ;;  %2152 = vmatpush1.bf16.msra.mxu1 %v2271_v25  ;;  %v2374_v25 = vld [vmem:[%s2797_s28 + $0x1e4] ss:$8 sps:$4 sm:$0xff]  }
  0x9e   : > { %857 = vmatprep.subr.bf16.mxu0 %v2272_v26  ;;  %2137 = vmatprep.subr.bf16.mxu1 %v2272_v26  ;;  %v2349_v26 = vld [vmem:[%s2797_s28 + $0xe0] ss:$8 sps:$4 sm:$0xff]  }
  0xa1   : > { %858 = vmatpush1.bf16.msra.mxu0 %v2274_v27  ;;  %2153 = vmatpush1.bf16.msra.mxu1 %v2274_v27  ;;  %v2376_v27 = vld [vmem:[%s2797_s28 + $0x1e0] ss:$8 sps:$4 sm:$0xff]  }
  0xa2   : > { %859 = vmatprep.subr.bf16.mxu0 %v2275_v28  ;;  %2138 = vmatprep.subr.bf16.mxu1 %v2275_v28  ;;  %v2353_v28 = vld [vmem:[%s2797_s28 + $0xf4] ss:$8 sps:$4 sm:$0xff]  }
  0xa5   : > { %860 = vmatpush1.bf16.msra.mxu0 %v2277_v29  ;;  %2154 = vmatpush1.bf16.msra.mxu1 %v2277_v29  ;;  %v2377_v29 = vld [vmem:[%s2797_s28 + $0x1f4] ss:$8 sps:$4 sm:$0xff]  }
  0xa6   : > { %861 = vmatprep.subr.bf16.mxu0 %v2278_v30  ;;  %2139 = vmatprep.subr.bf16.mxu1 %v2278_v30  ;;  %v2355_v30 = vld [vmem:[%s2797_s28 + $0xf0] ss:$8 sps:$4 sm:$0xff]  }
  0xa9   : > { %862 = vmatpush1.bf16.msra.mxu0 %v2280_v31  ;;  %2155 = vmatpush1.bf16.msra.mxu1 %v2280_v31  ;;  %v2379_v31 = vld [vmem:[%s2797_s28 + $0x1f0] ss:$8 sps:$4 sm:$0xff]  }
  0xaa   : > { %863 = vmatprep.subr.bf16.mxu0 %v2281_v32  ;;  %2140 = vmatprep.subr.bf16.mxu1 %v2281_v32  ;;  %v343_v32 = vlaneseq }
  0xad   : > { %864 = vmatpush1.bf16.msra.mxu0 %v2283_v33  ;;  %2156 = vmatpush1.bf16.msra.mxu1 %v2283_v33  ;;  %v344_v33 = vshrl.u32 %v343_v32, 7 }
  0xb0   : > { %866 = vmatmul.mubr.bf16.vlgmr.msra.gmra.mrb[0].mxu0 %v2284_v34  ;;  %1026 = vmatmul.mubr.bf16.vlgmr.msra.gmra.mrb[0].mxu1 %v2308_v35  ;;  %v345_v34 = vsub.s32 0, %v344_v33  ;;  %v341_v35 = vld [vmem:[#allocation7] ss:$8 sm:$0x3] }
  0xb1   : > { %875 = vmatprep.mubr.bf16.mxu0 %v2287_v36  ;;  %1035 = vmatprep.mubr.bf16.mxu1 %v2314_v37  ;;  %v349_v36 = vsub.s32 1, %v344_v33 }
  0xb2   : > { %v2872_v37 = vrot.slane %v341_v35, %v345_v34 }
  0xb8   : > { %876 = vmatmul.mubr.bf16.gmra.mrb[4].mxu0 %v2289_v38  ;;  %1036 = vmatmul.mubr.bf16.gmra.mrb[4].mxu1 %v2316_v39  ;;  %v2874_v38 = vrot.slane %v341_v35, %v349_v36 }
  0xb9   : > { %885 = vmatprep.mubr.bf16.mxu0 %v2290_v40  ;;  %1045 = vmatprep.mubr.bf16.mxu1 %v2320_v41 }
  0xc0   : > { %886 = vmatmul.mubr.bf16.gmra.mrb[8].mxu0 %v2292_v42  ;;  %1046 = vmatmul.mubr.bf16.gmra.mrb[8].mxu1 %v2322_v43 }
  0xc1   : > { %895 = vmatprep.mubr.bf16.mxu0 %v2293_v44  ;;  %1055 = vmatprep.mubr.bf16.mxu1 %v2326_v45 }
  0xc8   : > { %896 = vmatmul.mubr.bf16.gmra.mrb[12].mxu0 %v2295_v46  ;;  %1056 = vmatmul.mubr.bf16.gmra.mrb[12].mxu1 %v2328_v47 }
  0xc9   : > { %905 = vmatprep.mubr.bf16.mxu0 %v2296_v48  ;;  %1065 = vmatprep.mubr.bf16.mxu1 %v2332_v49 }
  0xd0   : > { %906 = vmatmul.mubr.bf16.gmra.mrb[16].mxu0 %v2298_v50  ;;  %1066 = vmatmul.mubr.bf16.gmra.mrb[16].mxu1 %v2334_v51 }
  0xd1   : > { %915 = vmatprep.mubr.bf16.mxu0 %v2299_v52  ;;  %1075 = vmatprep.mubr.bf16.mxu1 %v2338_v53 }
  0xd8   : > { %916 = vmatmul.mubr.bf16.gmra.mrb[20].mxu0 %v2301_v54  ;;  %1076 = vmatmul.mubr.bf16.gmra.mrb[20].mxu1 %v2340_v55 }
  0xd9   : > { %925 = vmatprep.mubr.bf16.mxu0 %v2302_v56  ;;  %1085 = vmatprep.mubr.bf16.mxu1 %v2344_v57 }
  0xe0   : > { %926 = vmatmul.mubr.bf16.gmra.mrb[24].mxu0 %v2304_v58  ;;  %1086 = vmatmul.mubr.bf16.gmra.mrb[24].mxu1 %v2346_v59 }
  0xe1   : > { %935 = vmatprep.mubr.bf16.mxu0 %v2305_v60  ;;  %1095 = vmatprep.mubr.bf16.mxu1 %v2350_v61 }
  0xe8   : > { %936 = vmatmul.mubr.bf16.gmra.mrb[28].mxu0 %v2307_v62  ;;  %1096 = vmatmul.mubr.bf16.gmra.mrb[28].mxu1 %v2352_v63 }
  0xe9   : > { %945 = vmatprep.mubr.bf16.mxu0 %v2311_v0  ;;  %1105 = vmatprep.mubr.bf16.mxu1 %v2356_v1 }
  0xf0   : > { %946 = vmatmul.mubr.bf16.gmra.mrb[32].mxu0 %v2313_v2  ;;  %1106 = vmatmul.mubr.bf16.gmra.mrb[32].mxu1 %v2358_v3 }
  0xf1   : > { %955 = vmatprep.mubr.bf16.mxu0 %v2317_v4  ;;  %1115 = vmatprep.mubr.bf16.mxu1 %v2359_v5 }
  0xf8   : > { %956 = vmatmul.mubr.bf16.gmra.mrb[36].mxu0 %v2319_v6  ;;  %1116 = vmatmul.mubr.bf16.gmra.mrb[36].mxu1 %v2361_v7 }
  0xf9   : > { %965 = vmatprep.mubr.bf16.mxu0 %v2323_v8  ;;  %1125 = vmatprep.mubr.bf16.mxu1 %v2362_v9 }
 0x100   : > { %966 = vmatmul.mubr.bf16.gmra.mrb[40].mxu0 %v2325_v10  ;;  %1126 = vmatmul.mubr.bf16.gmra.mrb[40].mxu1 %v2364_v11 }
 0x101   : > { %975 = vmatprep.mubr.bf16.mxu0 %v2329_v12  ;;  %1135 = vmatprep.mubr.bf16.mxu1 %v2365_v13 }
 0x108   : > { %976 = vmatmul.mubr.bf16.gmra.mrb[44].mxu0 %v2331_v14  ;;  %1136 = vmatmul.mubr.bf16.gmra.mrb[44].mxu1 %v2367_v15 }
 0x109   : > { %985 = vmatprep.mubr.bf16.mxu0 %v2335_v16  ;;  %1145 = vmatprep.mubr.bf16.mxu1 %v2368_v17 }
 0x110   : > { %986 = vmatmul.mubr.bf16.gmra.mrb[48].mxu0 %v2337_v18  ;;  %1146 = vmatmul.mubr.bf16.gmra.mrb[48].mxu1 %v2370_v19 }
 0x111   : > { %995 = vmatprep.mubr.bf16.mxu0 %v2341_v20  ;;  %1155 = vmatprep.mubr.bf16.mxu1 %v2371_v21 }
 0x118   : > { %996 = vmatmul.mubr.bf16.gmra.mrb[52].mxu0 %v2343_v22  ;;  %1156 = vmatmul.mubr.bf16.gmra.mrb[52].mxu1 %v2373_v23 }
 0x119   : > { %1005 = vmatprep.mubr.bf16.mxu0 %v2347_v24  ;;  %1165 = vmatprep.mubr.bf16.mxu1 %v2374_v25 }
 0x120   : > { %1006 = vmatmul.mubr.bf16.gmra.mrb[56].mxu0 %v2349_v26  ;;  %1166 = vmatmul.mubr.bf16.gmra.mrb[56].mxu1 %v2376_v27 }
 0x121   : > { %1015 = vmatprep.mubr.bf16.mxu0 %v2353_v28  ;;  %1175 = vmatprep.mubr.bf16.mxu1 %v2377_v29 }
 0x128   : > { %1016 = vmatmul.mubr.bf16.gmra.mrb[60].mxu0 %v2355_v30  ;;  %1176 = vmatmul.mubr.bf16.gmra.mrb[60].mxu1 %v2379_v31 }
 0x183   : > { %v867_v39 = vpop.f32.mrb[0].mxu0  ;;  %v1027_v40 = vpop.f32.mrb[0].mxu1 }
 0x184   : > { %v868_v41 = vadd.f32 %v867_v39, %v2872_v37  ;;  %v869_v42 = vpop.f32.mrb[1].mxu0  ;;  %v1028_v43 = vadd.f32 %v1027_v40, %v2872_v37  ;;  %v1029_v44 = vpop.f32.mrb[1].mxu1 }
 0x185   : > { %v870_v45 = vadd.f32 %v869_v42, %v2874_v38  ;;  %v871_v46 = vpop.f32.mrb[2].mxu0  ;;  %v1030_v47 = vadd.f32 %v1029_v44, %v2874_v38  ;;  %v1031_v48 = vpop.f32.mrb[2].mxu1 }
 0x186   : > { %1186 = vst [vmem:[%s2880_s23] sm:$0xff] %v868_v41  ;;  %v872_v49 = vadd.f32 %v871_v46, %v2872_v37  ;;  %v873_v50 = vpop.f32.mrb[3].mxu0  ;;  %1250 = vst [vmem:[%s2880_s23 + $0x200] sm:$0xff] %v1028_v43  ;;  %v1032_v51 = vadd.f32 %v1031_v48, %v2872_v37  ;;  %v1033_v52 = vpop.f32.mrb[3].mxu1  ;;  %v1452_v55 = vmul.f32 %v868_v41, %v868_v41 }
 0x187   : > { %1187 = vst [vmem:[%s2880_s23 + $0x8] sm:$0xff] %v870_v45  ;;  %v1718_v53 = vmul.f32 %v870_v45, %v868_v41  ;;  %v874_v54 = vadd.f32 %v873_v50, %v2874_v38  ;;  %1251 = vst [vmem:[%s2880_s23 + $0x208] sm:$0xff] %v1030_v47  ;;  %v1585_v56 = vmul.f32 %v870_v45, %v870_v45 }
 0x188   : > { %1188 = vst [vmem:[%s2880_s23 + $0x10] sm:$0xff] %v872_v49  ;;  %v1314_v57 = vadd.f32 %v872_v49, %v868_v41  ;;  %v1453_v58 = vmul.f32 %v872_v49, %v872_v49  ;;  %1252 = vst [vmem:[%s2880_s23 + $0x210] sm:$0xff] %v1032_v51  ;;  %v1034_v62 = vadd.f32 %v1033_v52, %v2874_v38 }
 0x189   : > { %1189 = vst [vmem:[%s2880_s23 + $0x18] sm:$0xff] %v874_v54  ;;  %v1383_v59 = vadd.f32 %v874_v54, %v870_v45  ;;  %v1586_v60 = vmul.f32 %v874_v54, %v874_v54  ;;  %v1719_v61 = vmul.f32 %v874_v54, %v872_v49 }
 0x18a   : > { %v1516_v63 = vadd.f32 %v1453_v58, %v1452_v55  ;;  %1253 = vst [vmem:[%s2880_s23 + $0x218] sm:$0xff] %v1034_v62 }
 0x18b   : > { %v1649_v0 = vadd.f32 %v1586_v60, %v1585_v56  ;;  %v1782_v1 = vadd.f32 %v1719_v61, %v1718_v53  ;;  %v877_v2 = vpop.f32.mrb[4].mxu0  ;;  %v1037_v3 = vpop.f32.mrb[4].mxu1 }
 0x18c   : > { %v878_v4 = vadd.f32 %v877_v2, %v2872_v37  ;;  %v879_v5 = vpop.f32.mrb[5].mxu0  ;;  %v1038_v6 = vadd.f32 %v1037_v3, %v2872_v37  ;;  %v1039_v7 = vpop.f32.mrb[5].mxu1 }
 0x18d   : > { %v880_v8 = vadd.f32 %v879_v5, %v2874_v38  ;;  %v881_v9 = vpop.f32.mrb[6].mxu0  ;;  %v1040_v10 = vadd.f32 %v1039_v7, %v2874_v38  ;;  %v1041_v11 = vpop.f32.mrb[6].mxu1 }
 0x18e   : > { %1190 = vst [vmem:[%s2880_s23 + $0x20] sm:$0xff] %v878_v4  ;;  %v1315_v12 = vadd.f32 %v1314_v57, %v878_v4  ;;  %v1454_v13 = vmul.f32 %v878_v4, %v878_v4  ;;  %v882_v14 = vadd.f32 %v881_v9, %v2872_v37  ;;  %v883_v15 = vpop.f32.mrb[7].mxu0  ;;  %1254 = vst [vmem:[%s2880_s23 + $0x220] sm:$0xff] %v1038_v6  ;;  %v1043_v16 = vpop.f32.mrb[7].mxu1 }
 0x18f   : > { %1191 = vst [vmem:[%s2880_s23 + $0x28] sm:$0xff] %v880_v8  ;;  %v1384_v17 = vadd.f32 %v1383_v59, %v880_v8  ;;  %v1587_v18 = vmul.f32 %v880_v8, %v880_v8  ;;  %v1720_v19 = vmul.f32 %v880_v8, %v878_v4  ;;  %v884_v20 = vadd.f32 %v883_v15, %v2874_v38 }
 0x190   : > { %1255 = vst [vmem:[%s2880_s23 + $0x228] sm:$0xff] %v1040_v10  ;;  %v1517_v21 = vadd.f32 %v1516_v63, %v1454_v13  ;;  %1192 = vst [vmem:[%s2880_s23 + $0x30] sm:$0xff] %v882_v14  ;;  %v1316_v22 = vadd.f32 %v1315_v12, %v882_v14  ;;  %v1455_v23 = vmul.f32 %v882_v14, %v882_v14 }
 0x191   : > { %v1650_v24 = vadd.f32 %v1649_v0, %v1587_v18  ;;  %v1783_v25 = vadd.f32 %v1782_v1, %v1720_v19  ;;  %1193 = vst [vmem:[%s2880_s23 + $0x38] sm:$0xff] %v884_v20  ;;  %v1385_v26 = vadd.f32 %v1384_v17, %v884_v20  ;;  %v1588_v27 = vmul.f32 %v884_v20, %v884_v20 }
 0x192   : > { %v1518_v28 = vadd.f32 %v1517_v21, %v1455_v23  ;;  %v1721_v29 = vmul.f32 %v884_v20, %v882_v14  ;;  %v1042_v30 = vadd.f32 %v1041_v11, %v2872_v37  ;;  %v1044_v33 = vadd.f32 %v1043_v16, %v2874_v38 }
 0x193   : > { %v1651_v31 = vadd.f32 %v1650_v24, %v1588_v27  ;;  %v887_v32 = vpop.f32.mrb[8].mxu0  ;;  %v1047_v34 = vpop.f32.mrb[8].mxu1 }
 0x194   : > { %v1784_v35 = vadd.f32 %v1783_v25, %v1721_v29  ;;  %v888_v36 = vadd.f32 %v887_v32, %v2872_v37  ;;  %v889_v39 = vpop.f32.mrb[9].mxu0  ;;  %1256 = vst [vmem:[%s2880_s23 + $0x230] sm:$0xff] %v1042_v30  ;;  %v1048_v40 = vadd.f32 %v1047_v34, %v2872_v37  ;;  %v1049_v41 = vpop.f32.mrb[9].mxu1  ;;  %1257 = vst [vmem:[%s2880_s23 + $0x238] sm:$0xff] %v1044_v33 }
 0x195   : > { %v890_v42 = vadd.f32 %v889_v39, %v2874_v38  ;;  %v891_v43 = vpop.f32.mrb[10].mxu0  ;;  %v1050_v44 = vadd.f32 %v1049_v41, %v2874_v38  ;;  %v1051_v45 = vpop.f32.mrb[10].mxu1 }
 0x196   : > { %1194 = vst [vmem:[%s2880_s23 + $0x40] sm:$0xff] %v888_v36  ;;  %v1317_v46 = vadd.f32 %v1316_v22, %v888_v36  ;;  %v1456_v47 = vmul.f32 %v888_v36, %v888_v36  ;;  %v892_v48 = vadd.f32 %v891_v43, %v2872_v37  ;;  %v893_v49 = vpop.f32.mrb[11].mxu0  ;;  %1258 = vst [vmem:[%s2880_s23 + $0x240] sm:$0xff] %v1048_v40  ;;  %v1053_v50 = vpop.f32.mrb[11].mxu1 }
 0x197   : > { %1195 = vst [vmem:[%s2880_s23 + $0x48] sm:$0xff] %v890_v42  ;;  %v1386_v51 = vadd.f32 %v1385_v26, %v890_v42  ;;  %v1589_v52 = vmul.f32 %v890_v42, %v890_v42  ;;  %v1722_v53 = vmul.f32 %v890_v42, %v888_v36  ;;  %v894_v54 = vadd.f32 %v893_v49, %v2874_v38 }
 0x198   : > { %1259 = vst [vmem:[%s2880_s23 + $0x248] sm:$0xff] %v1050_v44  ;;  %v1519_v55 = vadd.f32 %v1518_v28, %v1456_v47  ;;  %1196 = vst [vmem:[%s2880_s23 + $0x50] sm:$0xff] %v892_v48  ;;  %v1318_v56 = vadd.f32 %v1317_v46, %v892_v48  ;;  %v1457_v57 = vmul.f32 %v892_v48, %v892_v48 }
 0x199   : > { %v1652_v58 = vadd.f32 %v1651_v31, %v1589_v52  ;;  %v1785_v59 = vadd.f32 %v1784_v35, %v1722_v53  ;;  %1197 = vst [vmem:[%s2880_s23 + $0x58] sm:$0xff] %v894_v54  ;;  %v1387_v60 = vadd.f32 %v1386_v51, %v894_v54  ;;  %v1590_v61 = vmul.f32 %v894_v54, %v894_v54 }
 0x19a   : > { %v1520_v62 = vadd.f32 %v1519_v55, %v1457_v57  ;;  %v1723_v63 = vmul.f32 %v894_v54, %v892_v48  ;;  %v1052_v0 = vadd.f32 %v1051_v45, %v2872_v37  ;;  %v1054_v3 = vadd.f32 %v1053_v50, %v2874_v38 }
 0x19b   : > { %v1653_v1 = vadd.f32 %v1652_v58, %v1590_v61  ;;  %v897_v2 = vpop.f32.mrb[12].mxu0  ;;  %v1057_v4 = vpop.f32.mrb[12].mxu1 }
 0x19c   : > { %v1786_v5 = vadd.f32 %v1785_v59, %v1723_v63  ;;  %v898_v6 = vadd.f32 %v897_v2, %v2872_v37  ;;  %v899_v7 = vpop.f32.mrb[13].mxu0  ;;  %1260 = vst [vmem:[%s2880_s23 + $0x250] sm:$0xff] %v1052_v0  ;;  %v1058_v8 = vadd.f32 %v1057_v4, %v2872_v37  ;;  %v1059_v9 = vpop.f32.mrb[13].mxu1  ;;  %1261 = vst [vmem:[%s2880_s23 + $0x258] sm:$0xff] %v1054_v3 }
 0x19d   : > { %v900_v10 = vadd.f32 %v899_v7, %v2874_v38  ;;  %v901_v11 = vpop.f32.mrb[14].mxu0  ;;  %v1060_v12 = vadd.f32 %v1059_v9, %v2874_v38  ;;  %v1061_v13 = vpop.f32.mrb[14].mxu1 }
 0x19e   : > { %1198 = vst [vmem:[%s2880_s23 + $0x60] sm:$0xff] %v898_v6  ;;  %v1319_v14 = vadd.f32 %v1318_v56, %v898_v6  ;;  %v1458_v15 = vmul.f32 %v898_v6, %v898_v6  ;;  %v902_v16 = vadd.f32 %v901_v11, %v2872_v37  ;;  %v903_v17 = vpop.f32.mrb[15].mxu0  ;;  %1262 = vst [vmem:[%s2880_s23 + $0x260] sm:$0xff] %v1058_v8  ;;  %v1063_v18 = vpop.f32.mrb[15].mxu1 }
 0x19f   : > { %1199 = vst [vmem:[%s2880_s23 + $0x68] sm:$0xff] %v900_v10  ;;  %v1388_v19 = vadd.f32 %v1387_v60, %v900_v10  ;;  %v1591_v20 = vmul.f32 %v900_v10, %v900_v10  ;;  %v1724_v21 = vmul.f32 %v900_v10, %v898_v6  ;;  %v904_v22 = vadd.f32 %v903_v17, %v2874_v38 }
 0x1a0   : > { %1263 = vst [vmem:[%s2880_s23 + $0x268] sm:$0xff] %v1060_v12  ;;  %v1521_v23 = vadd.f32 %v1520_v62, %v1458_v15  ;;  %1200 = vst [vmem:[%s2880_s23 + $0x70] sm:$0xff] %v902_v16  ;;  %v1320_v24 = vadd.f32 %v1319_v14, %v902_v16  ;;  %v1459_v25 = vmul.f32 %v902_v16, %v902_v16 }
 0x1a1   : > { %v1654_v26 = vadd.f32 %v1653_v1, %v1591_v20  ;;  %v1787_v27 = vadd.f32 %v1786_v5, %v1724_v21  ;;  %1201 = vst [vmem:[%s2880_s23 + $0x78] sm:$0xff] %v904_v22  ;;  %v1389_v28 = vadd.f32 %v1388_v19, %v904_v22  ;;  %v1592_v29 = vmul.f32 %v904_v22, %v904_v22 }
 0x1a2   : > { %v1522_v30 = vadd.f32 %v1521_v23, %v1459_v25  ;;  %v1725_v31 = vmul.f32 %v904_v22, %v902_v16  ;;  %v1062_v32 = vadd.f32 %v1061_v13, %v2872_v37  ;;  %v1064_v35 = vadd.f32 %v1063_v18, %v2874_v38 }
 0x1a3   : > { %v1655_v33 = vadd.f32 %v1654_v26, %v1592_v29  ;;  %v907_v34 = vpop.f32.mrb[16].mxu0  ;;  %v1067_v36 = vpop.f32.mrb[16].mxu1 }
 0x1a4   : > { %v1788_v39 = vadd.f32 %v1787_v27, %v1725_v31  ;;  %v908_v40 = vadd.f32 %v907_v34, %v2872_v37  ;;  %v909_v41 = vpop.f32.mrb[17].mxu0  ;;  %1264 = vst [vmem:[%s2880_s23 + $0x270] sm:$0xff] %v1062_v32  ;;  %v1068_v42 = vadd.f32 %v1067_v36, %v2872_v37  ;;  %v1069_v43 = vpop.f32.mrb[17].mxu1  ;;  %1265 = vst [vmem:[%s2880_s23 + $0x278] sm:$0xff] %v1064_v35 }
 0x1a5   : > { %v910_v44 = vadd.f32 %v909_v41, %v2874_v38  ;;  %v911_v45 = vpop.f32.mrb[18].mxu0  ;;  %v1070_v46 = vadd.f32 %v1069_v43, %v2874_v38  ;;  %v1071_v47 = vpop.f32.mrb[18].mxu1 }
 0x1a6   : > { %1202 = vst [vmem:[%s2880_s23 + $0x80] sm:$0xff] %v908_v40  ;;  %v1321_v48 = vadd.f32 %v1320_v24, %v908_v40  ;;  %v1460_v49 = vmul.f32 %v908_v40, %v908_v40  ;;  %v912_v50 = vadd.f32 %v911_v45, %v2872_v37  ;;  %v913_v51 = vpop.f32.mrb[19].mxu0  ;;  %1266 = vst [vmem:[%s2880_s23 + $0x280] sm:$0xff] %v1068_v42  ;;  %v1073_v52 = vpop.f32.mrb[19].mxu1 }
 0x1a7   : > { %1203 = vst [vmem:[%s2880_s23 + $0x88] sm:$0xff] %v910_v44  ;;  %v1390_v53 = vadd.f32 %v1389_v28, %v910_v44  ;;  %v1593_v54 = vmul.f32 %v910_v44, %v910_v44  ;;  %v1726_v55 = vmul.f32 %v910_v44, %v908_v40  ;;  %v914_v56 = vadd.f32 %v913_v51, %v2874_v38 }
 0x1a8   : > { %1267 = vst [vmem:[%s2880_s23 + $0x288] sm:$0xff] %v1070_v46  ;;  %v1523_v57 = vadd.f32 %v1522_v30, %v1460_v49  ;;  %1204 = vst [vmem:[%s2880_s23 + $0x90] sm:$0xff] %v912_v50  ;;  %v1322_v58 = vadd.f32 %v1321_v48, %v912_v50  ;;  %v1461_v59 = vmul.f32 %v912_v50, %v912_v50 }
 0x1a9   : > { %v1656_v60 = vadd.f32 %v1655_v33, %v1593_v54  ;;  %v1789_v61 = vadd.f32 %v1788_v39, %v1726_v55  ;;  %1205 = vst [vmem:[%s2880_s23 + $0x98] sm:$0xff] %v914_v56  ;;  %v1391_v62 = vadd.f32 %v1390_v53, %v914_v56  ;;  %v1594_v63 = vmul.f32 %v914_v56, %v914_v56 }
 0x1aa   : > { %v1524_v0 = vadd.f32 %v1523_v57, %v1461_v59  ;;  %v1727_v1 = vmul.f32 %v914_v56, %v912_v50  ;;  %v2955_v2 = vadd.f32 %v1071_v47, %v2872_v37  ;;  %v2958_v5 = vadd.f32 %v1073_v52, %v2874_v38 }
 0x1ab   : > { %v1657_v3 = vadd.f32 %v1656_v60, %v1594_v63  ;;  %v917_v4 = vpop.f32.mrb[20].mxu0  ;;  %v1077_v6 = vpop.f32.mrb[20].mxu1 }
 0x1ac   : > { %v1790_v7 = vadd.f32 %v1789_v61, %v1727_v1  ;;  %v918_v8 = vadd.f32 %v917_v4, %v2872_v37  ;;  %v919_v9 = vpop.f32.mrb[21].mxu0  ;;  %1268 = vst [vmem:[%s2880_s23 + $0x290] sm:$0xff] %v2955_v2  ;;  %v2964_v10 = vadd.f32 %v1077_v6, %v2872_v37  ;;  %v1079_v11 = vpop.f32.mrb[21].mxu1  ;;  %1269 = vst [vmem:[%s2880_s23 + $0x298] sm:$0xff] %v2958_v5 }
 0x1ad   : > { %v920_v12 = vadd.f32 %v919_v9, %v2874_v38  ;;  %v921_v13 = vpop.f32.mrb[22].mxu0  ;;  %v2970_v14 = vadd.f32 %v1079_v11, %v2874_v38  ;;  %v1081_v15 = vpop.f32.mrb[22].mxu1 }
 0x1ae   : > { %1206 = vst [vmem:[%s2880_s23 + $0xa0] sm:$0xff] %v918_v8  ;;  %v1323_v16 = vadd.f32 %v1322_v58, %v918_v8  ;;  %v1462_v17 = vmul.f32 %v918_v8, %v918_v8  ;;  %v922_v18 = vadd.f32 %v921_v13, %v2872_v37  ;;  %v923_v19 = vpop.f32.mrb[23].mxu0  ;;  %1270 = vst [vmem:[%s2880_s23 + $0x2a0] sm:$0xff] %v2964_v10  ;;  %v1083_v20 = vpop.f32.mrb[23].mxu1 }
 0x1af   : > { %1207 = vst [vmem:[%s2880_s23 + $0xa8] sm:$0xff] %v920_v12  ;;  %v1392_v21 = vadd.f32 %v1391_v62, %v920_v12  ;;  %v1595_v22 = vmul.f32 %v920_v12, %v920_v12  ;;  %v1728_v23 = vmul.f32 %v920_v12, %v918_v8  ;;  %v924_v24 = vadd.f32 %v923_v19, %v2874_v38 }
 0x1b0   : > { %1271 = vst [vmem:[%s2880_s23 + $0x2a8] sm:$0xff] %v2970_v14  ;;  %v1525_v25 = vadd.f32 %v1524_v0, %v1462_v17  ;;  %1208 = vst [vmem:[%s2880_s23 + $0xb0] sm:$0xff] %v922_v18  ;;  %v1324_v26 = vadd.f32 %v1323_v16, %v922_v18  ;;  %v1463_v27 = vmul.f32 %v922_v18, %v922_v18 }
 0x1b1   : > { %v1658_v28 = vadd.f32 %v1657_v3, %v1595_v22  ;;  %v1791_v29 = vadd.f32 %v1790_v7, %v1728_v23  ;;  %1209 = vst [vmem:[%s2880_s23 + $0xb8] sm:$0xff] %v924_v24  ;;  %v1393_v30 = vadd.f32 %v1392_v21, %v924_v24  ;;  %v1596_v31 = vmul.f32 %v924_v24, %v924_v24 }
 0x1b2   : > { %v1526_v32 = vadd.f32 %v1525_v25, %v1463_v27  ;;  %v1729_v33 = vmul.f32 %v924_v24, %v922_v18  ;;  %v2983_v34 = vadd.f32 %v1081_v15, %v2872_v37  ;;  %v2986_v39 = vadd.f32 %v1083_v20, %v2874_v38 }
 0x1b3   : > { %v1659_v35 = vadd.f32 %v1658_v28, %v1596_v31  ;;  %v927_v36 = vpop.f32.mrb[24].mxu0  ;;  %v1087_v40 = vpop.f32.mrb[24].mxu1 }
 0x1b4   : > { %v1792_v41 = vadd.f32 %v1791_v29, %v1729_v33  ;;  %v928_v42 = vadd.f32 %v927_v36, %v2872_v37  ;;  %v929_v43 = vpop.f32.mrb[25].mxu0  ;;  %1272 = vst [vmem:[%s2880_s23 + $0x2b0] sm:$0xff] %v2983_v34  ;;  %v2992_v44 = vadd.f32 %v1087_v40, %v2872_v37  ;;  %v1089_v45 = vpop.f32.mrb[25].mxu1  ;;  %1273 = vst [vmem:[%s2880_s23 + $0x2b8] sm:$0xff] %v2986_v39 }
 0x1b5   : > { %v930_v46 = vadd.f32 %v929_v43, %v2874_v38  ;;  %v931_v47 = vpop.f32.mrb[26].mxu0  ;;  %v2998_v48 = vadd.f32 %v1089_v45, %v2874_v38  ;;  %v1091_v49 = vpop.f32.mrb[26].mxu1 }
 0x1b6   : > { %1210 = vst [vmem:[%s2880_s23 + $0xc0] sm:$0xff] %v928_v42  ;;  %v1325_v50 = vadd.f32 %v1324_v26, %v928_v42  ;;  %v1464_v51 = vmul.f32 %v928_v42, %v928_v42  ;;  %v932_v52 = vadd.f32 %v931_v47, %v2872_v37  ;;  %v933_v53 = vpop.f32.mrb[27].mxu0  ;;  %1274 = vst [vmem:[%s2880_s23 + $0x2c0] sm:$0xff] %v2992_v44  ;;  %v1093_v54 = vpop.f32.mrb[27].mxu1 }
 0x1b7   : > { %1211 = vst [vmem:[%s2880_s23 + $0xc8] sm:$0xff] %v930_v46  ;;  %v1394_v55 = vadd.f32 %v1393_v30, %v930_v46  ;;  %v1597_v56 = vmul.f32 %v930_v46, %v930_v46  ;;  %v1730_v57 = vmul.f32 %v930_v46, %v928_v42  ;;  %v934_v58 = vadd.f32 %v933_v53, %v2874_v38 }
 0x1b8   : > { %1275 = vst [vmem:[%s2880_s23 + $0x2c8] sm:$0xff] %v2998_v48  ;;  %v1527_v59 = vadd.f32 %v1526_v32, %v1464_v51  ;;  %1212 = vst [vmem:[%s2880_s23 + $0xd0] sm:$0xff] %v932_v52  ;;  %v1326_v60 = vadd.f32 %v1325_v50, %v932_v52  ;;  %v1465_v61 = vmul.f32 %v932_v52, %v932_v52 }
 0x1b9   : > { %v1660_v62 = vadd.f32 %v1659_v35, %v1597_v56  ;;  %v1793_v63 = vadd.f32 %v1792_v41, %v1730_v57  ;;  %1213 = vst [vmem:[%s2880_s23 + $0xd8] sm:$0xff] %v934_v58  ;;  %v1395_v0 = vadd.f32 %v1394_v55, %v934_v58  ;;  %v1598_v1 = vmul.f32 %v934_v58, %v934_v58 }
 0x1ba   : > { %v1528_v3 = vadd.f32 %v1527_v59, %v1465_v61  ;;  %v1731_v4 = vmul.f32 %v934_v58, %v932_v52  ;;  %v3011_v6 = vadd.f32 %v1091_v49, %v2872_v37  ;;  %v3014_v9 = vadd.f32 %v1093_v54, %v2874_v38 }
 0x1bb   : > { %v1661_v7 = vadd.f32 %v1660_v62, %v1598_v1  ;;  %v937_v8 = vpop.f32.mrb[28].mxu0  ;;  %v1097_v11 = vpop.f32.mrb[28].mxu1 }
 0x1bc   : > { %v1794_v12 = vadd.f32 %v1793_v63, %v1731_v4  ;;  %v938_v13 = vadd.f32 %v937_v8, %v2872_v37  ;;  %v939_v15 = vpop.f32.mrb[29].mxu0  ;;  %1276 = vst [vmem:[%s2880_s23 + $0x2d0] sm:$0xff] %v3011_v6  ;;  %v3020_v16 = vadd.f32 %v1097_v11, %v2872_v37  ;;  %v1099_v17 = vpop.f32.mrb[29].mxu1  ;;  %1277 = vst [vmem:[%s2880_s23 + $0x2d8] sm:$0xff] %v3014_v9 }
 0x1bd   : > { %v940_v18 = vadd.f32 %v939_v15, %v2874_v38  ;;  %v941_v19 = vpop.f32.mrb[30].mxu0  ;;  %v3026_v20 = vadd.f32 %v1099_v17, %v2874_v38  ;;  %v1101_v21 = vpop.f32.mrb[30].mxu1 }
 0x1be   : > { %1214 = vst [vmem:[%s2880_s23 + $0xe0] sm:$0xff] %v938_v13  ;;  %v1327_v22 = vadd.f32 %v1326_v60, %v938_v13  ;;  %v1466_v23 = vmul.f32 %v938_v13, %v938_v13  ;;  %v942_v24 = vadd.f32 %v941_v19, %v2872_v37  ;;  %v943_v25 = vpop.f32.mrb[31].mxu0  ;;  %1278 = vst [vmem:[%s2880_s23 + $0x2e0] sm:$0xff] %v3020_v16  ;;  %v1103_v26 = vpop.f32.mrb[31].mxu1 }
 0x1bf   : > { %1215 = vst [vmem:[%s2880_s23 + $0xe8] sm:$0xff] %v940_v18  ;;  %v1396_v27 = vadd.f32 %v1395_v0, %v940_v18  ;;  %v1599_v28 = vmul.f32 %v940_v18, %v940_v18  ;;  %v1732_v29 = vmul.f32 %v940_v18, %v938_v13  ;;  %v944_v30 = vadd.f32 %v943_v25, %v2874_v38 }
 0x1c0   : > { %1279 = vst [vmem:[%s2880_s23 + $0x2e8] sm:$0xff] %v3026_v20  ;;  %v1529_v31 = vadd.f32 %v1528_v3, %v1466_v23  ;;  %1216 = vst [vmem:[%s2880_s23 + $0xf0] sm:$0xff] %v942_v24  ;;  %v1328_v32 = vadd.f32 %v1327_v22, %v942_v24  ;;  %v1467_v33 = vmul.f32 %v942_v24, %v942_v24 }
 0x1c1   : > { %v1662_v35 = vadd.f32 %v1661_v7, %v1599_v28  ;;  %v1795_v36 = vadd.f32 %v1794_v12, %v1732_v29  ;;  %1217 = vst [vmem:[%s2880_s23 + $0xf8] sm:$0xff] %v944_v30  ;;  %v1397_v40 = vadd.f32 %v1396_v27, %v944_v30  ;;  %v1600_v41 = vmul.f32 %v944_v30, %v944_v30 }
 0x1c2   : > { %v1530_v42 = vadd.f32 %v1529_v31, %v1467_v33  ;;  %v1733_v43 = vmul.f32 %v944_v30, %v942_v24  ;;  %v3039_v45 = vadd.f32 %v1101_v21, %v2872_v37  ;;  %v3042_v49 = vadd.f32 %v1103_v26, %v2874_v38 }
 0x1c3   : > { %v1663_v46 = vadd.f32 %v1662_v35, %v1600_v41  ;;  %v947_v47 = vpop.f32.mrb[32].mxu0  ;;  %v1107_v50 = vpop.f32.mrb[32].mxu1 }
 0x1c4   : > { %v1796_v51 = vadd.f32 %v1795_v36, %v1733_v43  ;;  %v948_v52 = vadd.f32 %v947_v47, %v2872_v37  ;;  %v949_v53 = vpop.f32.mrb[33].mxu0  ;;  %1280 = vst [vmem:[%s2880_s23 + $0x2f0] sm:$0xff] %v3039_v45  ;;  %v3048_v54 = vadd.f32 %v1107_v50, %v2872_v37  ;;  %v1109_v55 = vpop.f32.mrb[33].mxu1  ;;  %1281 = vst [vmem:[%s2880_s23 + $0x2f8] sm:$0xff] %v3042_v49 }
 0x1c5   : > { %v950_v56 = vadd.f32 %v949_v53, %v2874_v38  ;;  %v951_v57 = vpop.f32.mrb[34].mxu0  ;;  %v3054_v58 = vadd.f32 %v1109_v55, %v2874_v38  ;;  %v1111_v59 = vpop.f32.mrb[34].mxu1 }
 0x1c6   : > { %1218 = vst [vmem:[%s2880_s23 + $0x100] sm:$0xff] %v948_v52  ;;  %v1329_v60 = vadd.f32 %v1328_v32, %v948_v52  ;;  %v1468_v61 = vmul.f32 %v948_v52, %v948_v52  ;;  %v952_v62 = vadd.f32 %v951_v57, %v2872_v37  ;;  %v953_v63 = vpop.f32.mrb[35].mxu0  ;;  %1282 = vst [vmem:[%s2880_s23 + $0x300] sm:$0xff] %v3048_v54  ;;  %v1113_v0 = vpop.f32.mrb[35].mxu1 }
 0x1c7   : > { %1219 = vst [vmem:[%s2880_s23 + $0x108] sm:$0xff] %v950_v56  ;;  %v1398_v1 = vadd.f32 %v1397_v40, %v950_v56  ;;  %v1601_v3 = vmul.f32 %v950_v56, %v950_v56  ;;  %v1734_v4 = vmul.f32 %v950_v56, %v948_v52  ;;  %v954_v7 = vadd.f32 %v953_v63, %v2874_v38 }
 0x1c8   : > { %1283 = vst [vmem:[%s2880_s23 + $0x308] sm:$0xff] %v3054_v58  ;;  %v1531_v8 = vadd.f32 %v1530_v42, %v1468_v61  ;;  %1220 = vst [vmem:[%s2880_s23 + $0x110] sm:$0xff] %v952_v62  ;;  %v1330_v11 = vadd.f32 %v1329_v60, %v952_v62  ;;  %v1469_v12 = vmul.f32 %v952_v62, %v952_v62 }
 0x1c9   : > { %v1664_v13 = vadd.f32 %v1663_v46, %v1601_v3  ;;  %v1797_v15 = vadd.f32 %v1796_v51, %v1734_v4  ;;  %1221 = vst [vmem:[%s2880_s23 + $0x118] sm:$0xff] %v954_v7  ;;  %v1399_v17 = vadd.f32 %v1398_v1, %v954_v7  ;;  %v1602_v18 = vmul.f32 %v954_v7, %v954_v7 }
 0x1ca   : > { %v1532_v19 = vadd.f32 %v1531_v8, %v1469_v12  ;;  %v1735_v21 = vmul.f32 %v954_v7, %v952_v62  ;;  %v3067_v22 = vadd.f32 %v1111_v59, %v2872_v37  ;;  %v3070_v25 = vadd.f32 %v1113_v0, %v2874_v38 }
 0x1cb   : > { %v1665_v23 = vadd.f32 %v1664_v13, %v1602_v18  ;;  %v957_v24 = vpop.f32.mrb[36].mxu0  ;;  %v1117_v26 = vpop.f32.mrb[36].mxu1 }
 0x1cc   : > { %v1798_v27 = vadd.f32 %v1797_v15, %v1735_v21  ;;  %v958_v28 = vadd.f32 %v957_v24, %v2872_v37  ;;  %v959_v29 = vpop.f32.mrb[37].mxu0  ;;  %1284 = vst [vmem:[%s2880_s23 + $0x310] sm:$0xff] %v3067_v22  ;;  %v3076_v30 = vadd.f32 %v1117_v26, %v2872_v37  ;;  %v1119_v31 = vpop.f32.mrb[37].mxu1  ;;  %1285 = vst [vmem:[%s2880_s23 + $0x318] sm:$0xff] %v3070_v25 }
 0x1cd   : > { %v960_v32 = vadd.f32 %v959_v29, %v2874_v38  ;;  %v961_v33 = vpop.f32.mrb[38].mxu0  ;;  %v3082_v35 = vadd.f32 %v1119_v31, %v2874_v38  ;;  %v1121_v36 = vpop.f32.mrb[38].mxu1 }
 0x1ce   : > { %1222 = vst [vmem:[%s2880_s23 + $0x120] sm:$0xff] %v958_v28  ;;  %v1331_v40 = vadd.f32 %v1330_v11, %v958_v28  ;;  %v1470_v41 = vmul.f32 %v958_v28, %v958_v28  ;;  %v962_v42 = vadd.f32 %v961_v33, %v2872_v37  ;;  %v963_v43 = vpop.f32.mrb[39].mxu0  ;;  %1286 = vst [vmem:[%s2880_s23 + $0x320] sm:$0xff] %v3076_v30  ;;  %v1123_v46 = vpop.f32.mrb[39].mxu1 }
 0x1cf   : > { %1223 = vst [vmem:[%s2880_s23 + $0x128] sm:$0xff] %v960_v32  ;;  %v1400_v47 = vadd.f32 %v1399_v17, %v960_v32  ;;  %v1603_v50 = vmul.f32 %v960_v32, %v960_v32  ;;  %v1736_v51 = vmul.f32 %v960_v32, %v958_v28  ;;  %v964_v52 = vadd.f32 %v963_v43, %v2874_v38 }
 0x1d0   : > { %1287 = vst [vmem:[%s2880_s23 + $0x328] sm:$0xff] %v3082_v35  ;;  %v1533_v53 = vadd.f32 %v1532_v19, %v1470_v41  ;;  %1224 = vst [vmem:[%s2880_s23 + $0x130] sm:$0xff] %v962_v42  ;;  %v1332_v55 = vadd.f32 %v1331_v40, %v962_v42  ;;  %v1471_v56 = vmul.f32 %v962_v42, %v962_v42 }
 0x1d1   : > { %v1666_v57 = vadd.f32 %v1665_v23, %v1603_v50  ;;  %v1799_v59 = vadd.f32 %v1798_v27, %v1736_v51  ;;  %1225 = vst [vmem:[%s2880_s23 + $0x138] sm:$0xff] %v964_v52  ;;  %v1401_v60 = vadd.f32 %v1400_v47, %v964_v52  ;;  %v1604_v61 = vmul.f32 %v964_v52, %v964_v52 }
 0x1d2   : > { %v1534_v62 = vadd.f32 %v1533_v53, %v1471_v56  ;;  %v1737_v63 = vmul.f32 %v964_v52, %v962_v42  ;;  %v3095_v0 = vadd.f32 %v1121_v36, %v2872_v37  ;;  %v3098_v4 = vadd.f32 %v1123_v46, %v2874_v38 }
 0x1d3   : > { %v1667_v1 = vadd.f32 %v1666_v57, %v1604_v61  ;;  %v967_v3 = vpop.f32.mrb[40].mxu0  ;;  %v1127_v7 = vpop.f32.mrb[40].mxu1 }
 0x1d4   : > { %v1800_v8 = vadd.f32 %v1799_v59, %v1737_v63  ;;  %v968_v11 = vadd.f32 %v967_v3, %v2872_v37  ;;  %v969_v12 = vpop.f32.mrb[41].mxu0  ;;  %1288 = vst [vmem:[%s2880_s23 + $0x330] sm:$0xff] %v3095_v0  ;;  %v3104_v13 = vadd.f32 %v1127_v7, %v2872_v37  ;;  %v1129_v15 = vpop.f32.mrb[41].mxu1  ;;  %1289 = vst [vmem:[%s2880_s23 + $0x338] sm:$0xff] %v3098_v4 }
 0x1d5   : > { %v970_v17 = vadd.f32 %v969_v12, %v2874_v38  ;;  %v971_v18 = vpop.f32.mrb[42].mxu0  ;;  %v3110_v19 = vadd.f32 %v1129_v15, %v2874_v38  ;;  %v1131_v21 = vpop.f32.mrb[42].mxu1 }
 0x1d6   : > { %1226 = vst [vmem:[%s2880_s23 + $0x140] sm:$0xff] %v968_v11  ;;  %v1333_v23 = vadd.f32 %v1332_v55, %v968_v11  ;;  %v1472_v24 = vmul.f32 %v968_v11, %v968_v11  ;;  %v972_v26 = vadd.f32 %v971_v18, %v2872_v37  ;;  %v973_v27 = vpop.f32.mrb[43].mxu0  ;;  %1290 = vst [vmem:[%s2880_s23 + $0x340] sm:$0xff] %v3104_v13  ;;  %v1133_v28 = vpop.f32.mrb[43].mxu1 }
 0x1d7   : > { %1227 = vst [vmem:[%s2880_s23 + $0x148] sm:$0xff] %v970_v17  ;;  %v1402_v29 = vadd.f32 %v1401_v60, %v970_v17  ;;  %v1605_v31 = vmul.f32 %v970_v17, %v970_v17  ;;  %v1738_v32 = vmul.f32 %v970_v17, %v968_v11  ;;  %v974_v33 = vadd.f32 %v973_v27, %v2874_v38 }
 0x1d8   : > { %1291 = vst [vmem:[%s2880_s23 + $0x348] sm:$0xff] %v3110_v19  ;;  %v1535_v36 = vadd.f32 %v1534_v62, %v1472_v24  ;;  %1228 = vst [vmem:[%s2880_s23 + $0x150] sm:$0xff] %v972_v26  ;;  %v1334_v40 = vadd.f32 %v1333_v23, %v972_v26  ;;  %v1473_v41 = vmul.f32 %v972_v26, %v972_v26 }
 0x1d9   : > { %v1668_v42 = vadd.f32 %v1667_v1, %v1605_v31  ;;  %v1801_v43 = vadd.f32 %v1800_v8, %v1738_v32  ;;  %1229 = vst [vmem:[%s2880_s23 + $0x158] sm:$0xff] %v974_v33  ;;  %v1403_v46 = vadd.f32 %v1402_v29, %v974_v33  ;;  %v1606_v47 = vmul.f32 %v974_v33, %v974_v33 }
 0x1da   : > { %v1536_v50 = vadd.f32 %v1535_v36, %v1473_v41  ;;  %v1739_v51 = vmul.f32 %v974_v33, %v972_v26  ;;  %v3123_v52 = vadd.f32 %v1131_v21, %v2872_v37  ;;  %v3126_v56 = vadd.f32 %v1133_v28, %v2874_v38 }
 0x1db   : > { %v1669_v53 = vadd.f32 %v1668_v42, %v1606_v47  ;;  %v977_v55 = vpop.f32.mrb[44].mxu0  ;;  %v1137_v57 = vpop.f32.mrb[44].mxu1 }
 0x1dc   : > { %v1802_v59 = vadd.f32 %v1801_v43, %v1739_v51  ;;  %v978_v60 = vadd.f32 %v977_v55, %v2872_v37  ;;  %v979_v61 = vpop.f32.mrb[45].mxu0  ;;  %1292 = vst [vmem:[%s2880_s23 + $0x350] sm:$0xff] %v3123_v52  ;;  %v3132_v62 = vadd.f32 %v1137_v57, %v2872_v37  ;;  %v1139_v63 = vpop.f32.mrb[45].mxu1  ;;  %1293 = vst [vmem:[%s2880_s23 + $0x358] sm:$0xff] %v3126_v56 }
 0x1dd   : > { %v980_v1 = vadd.f32 %v979_v61, %v2874_v38  ;;  %v981_v3 = vpop.f32.mrb[46].mxu0  ;;  %v3138_v7 = vadd.f32 %v1139_v63, %v2874_v38  ;;  %v1141_v8 = vpop.f32.mrb[46].mxu1 }
 0x1de   : > { %1230 = vst [vmem:[%s2880_s23 + $0x160] sm:$0xff] %v978_v60  ;;  %v1335_v11 = vadd.f32 %v1334_v40, %v978_v60  ;;  %v1474_v12 = vmul.f32 %v978_v60, %v978_v60  ;;  %v982_v15 = vadd.f32 %v981_v3, %v2872_v37  ;;  %v983_v17 = vpop.f32.mrb[47].mxu0  ;;  %1294 = vst [vmem:[%s2880_s23 + $0x360] sm:$0xff] %v3132_v62  ;;  %v1143_v18 = vpop.f32.mrb[47].mxu1 }
 0x1df   : > { %3605 = vst [vmem:[#allocation15_spill] sm:$0xff] %v3138_v7  ;;  %1231 = vst [vmem:[%s2880_s23 + $0x168] sm:$0xff] %v980_v1  ;;  %v1404_v21 = vadd.f32 %v1403_v46, %v980_v1  ;;  %v1607_v23 = vmul.f32 %v980_v1, %v980_v1  ;;  %v1740_v24 = vmul.f32 %v980_v1, %v978_v60 }
 0x1e0   : > { %v984_v26 = vadd.f32 %v983_v17, %v2874_v38  ;;  %1295 = vst [vmem:[%s2880_s23 + $0x368] sm:$0xff] %v3138_v7  ;;  %v1537_v27 = vadd.f32 %v1536_v50, %v1474_v12  ;;  %1232 = vst [vmem:[%s2880_s23 + $0x170] sm:$0xff] %v982_v15  ;;  %v1336_v28 = vadd.f32 %v1335_v11, %v982_v15 }
 0x1e1   : > { %v1475_v29 = vmul.f32 %v982_v15, %v982_v15  ;;  %v1670_v31 = vadd.f32 %v1669_v53, %v1607_v23  ;;  %v1803_v32 = vadd.f32 %v1802_v59, %v1740_v24  ;;  %v3151_v42 = vadd.f32 %v1141_v8, %v2872_v37 }
 0x1e2   : > { %1233 = vst [vmem:[%s2880_s23 + $0x178] sm:$0xff] %v984_v26  ;;  %v1405_v33 = vadd.f32 %v1404_v21, %v984_v26  ;;  %v1608_v36 = vmul.f32 %v984_v26, %v984_v26  ;;  %v1741_v41 = vmul.f32 %v984_v26, %v982_v15  ;;  %v3154_v47 = vadd.f32 %v1143_v18, %v2874_v38 }
 0x1e3   : > { %v1538_v40 = vadd.f32 %v1537_v27, %v1475_v29  ;;  %3606 = vst [vmem:[#allocation16_spill] sm:$0xff] %v3151_v42  ;;  %v987_v46 = vpop.f32.mrb[48].mxu0  ;;  %v1147_v50 = vpop.f32.mrb[48].mxu1  ;;  %1296 = vst [vmem:[%s2880_s23 + $0x370] sm:$0xff] %v3151_v42 }
 0x1e4   : > { %v1671_v43 = vadd.f32 %v1670_v31, %v1608_v36  ;;  %3607 = vst [vmem:[#allocation17_spill] sm:$0xff] %v3154_v47  ;;  %v1804_v51 = vadd.f32 %v1803_v32, %v1741_v41  ;;  %v988_v53 = vadd.f32 %v987_v46, %v2872_v37  ;;  %v989_v55 = vpop.f32.mrb[49].mxu0  ;;  %v3160_v57 = vadd.f32 %v1147_v50, %v2872_v37  ;;  %v1149_v59 = vpop.f32.mrb[49].mxu1 }
 0x1e5   : > { %v990_v60 = vadd.f32 %v989_v55, %v2874_v38  ;;  %v991_v61 = vpop.f32.mrb[50].mxu0  ;;  %1297 = vst [vmem:[%s2880_s23 + $0x378] sm:$0xff] %v3154_v47  ;;  %v3166_v63 = vadd.f32 %v1149_v59, %v2874_v38  ;;  %v1151_v1 = vpop.f32.mrb[50].mxu1 }
 0x1e6   : > { %3608 = vst [vmem:[#allocation18_spill] sm:$0xff] %v3160_v57  ;;  %1234 = vst [vmem:[%s2880_s23 + $0x180] sm:$0xff] %v988_v53  ;;  %v1337_v3 = vadd.f32 %v1336_v28, %v988_v53  ;;  %v1476_v8 = vmul.f32 %v988_v53, %v988_v53  ;;  %v992_v11 = vadd.f32 %v991_v61, %v2872_v37  ;;  %v993_v12 = vpop.f32.mrb[51].mxu0  ;;  %v1153_v15 = vpop.f32.mrb[51].mxu1 }
 0x1e7   : > { %3609 = vst [vmem:[#allocation19_spill] sm:$0xff] %v3166_v63  ;;  %1298 = vst [vmem:[%s2880_s23 + $0x380] sm:$0xff] %v3160_v57  ;;  %v1406_v17 = vadd.f32 %v1405_v33, %v990_v60  ;;  %v1609_v18 = vmul.f32 %v990_v60, %v990_v60  ;;  %v1742_v21 = vmul.f32 %v990_v60, %v988_v53 }
 0x1e8   : > { %1235 = vst [vmem:[%s2880_s23 + $0x188] sm:$0xff] %v990_v60  ;;  %v994_v23 = vadd.f32 %v993_v12, %v2874_v38  ;;  %1299 = vst [vmem:[%s2880_s23 + $0x388] sm:$0xff] %v3166_v63  ;;  %v1539_v24 = vadd.f32 %v1538_v40, %v1476_v8  ;;  %v1338_v26 = vadd.f32 %v1337_v3, %v992_v11 }
 0x1e9   : > { %1236 = vst [vmem:[%s2880_s23 + $0x190] sm:$0xff] %v992_v11  ;;  %v1477_v27 = vmul.f32 %v992_v11, %v992_v11  ;;  %v1672_v28 = vadd.f32 %v1671_v43, %v1609_v18  ;;  %v1805_v29 = vadd.f32 %v1804_v51, %v1742_v21  ;;  %v3179_v33 = vadd.f32 %v1151_v1, %v2872_v37 }
 0x1ea   : > { %1237 = vst [vmem:[%s2880_s23 + $0x198] sm:$0xff] %v994_v23  ;;  %v1407_v31 = vadd.f32 %v1406_v17, %v994_v23  ;;  %v1610_v32 = vmul.f32 %v994_v23, %v994_v23  ;;  %v1743_v41 = vmul.f32 %v994_v23, %v992_v11  ;;  %v3182_v40 = vadd.f32 %v1153_v15, %v2874_v38 }
 0x1eb   : > { %v1540_v36 = vadd.f32 %v1539_v24, %v1477_v27  ;;  %3610 = vst [vmem:[#allocation20_spill] sm:$0xff] %v3179_v33  ;;  %v997_v50 = vpop.f32.mrb[52].mxu0  ;;  %v1157_v53 = vpop.f32.mrb[52].mxu1  ;;  %1300 = vst [vmem:[%s2880_s23 + $0x390] sm:$0xff] %v3179_v33 }
 0x1ec   : > { %v1673_v46 = vadd.f32 %v1672_v28, %v1610_v32  ;;  %3611 = vst [vmem:[#allocation21_spill] sm:$0xff] %v3182_v40  ;;  %v1806_v55 = vadd.f32 %v1805_v29, %v1743_v41  ;;  %v998_v43 = vadd.f32 %v997_v50, %v2872_v37  ;;  %v999_v51 = vpop.f32.mrb[53].mxu0  ;;  %v3188_v59 = vadd.f32 %v1157_v53, %v2872_v37  ;;  %v1159_v60 = vpop.f32.mrb[53].mxu1 }
 0x1ed   : > { %v1000_v61 = vadd.f32 %v999_v51, %v2874_v38  ;;  %v1001_v1 = vpop.f32.mrb[54].mxu0  ;;  %1301 = vst [vmem:[%s2880_s23 + $0x398] sm:$0xff] %v3182_v40  ;;  %v3194_v3 = vadd.f32 %v1159_v60, %v2874_v38  ;;  %v1161_v8 = vpop.f32.mrb[54].mxu1 }
 0x1ee   : > { %3612 = vst [vmem:[#allocation22_spill] sm:$0xff] %v3188_v59  ;;  %1238 = vst [vmem:[%s2880_s23 + $0x1a0] sm:$0xff] %v998_v43  ;;  %v1339_v11 = vadd.f32 %v1338_v26, %v998_v43  ;;  %v1478_v12 = vmul.f32 %v998_v43, %v998_v43  ;;  %v1002_v15 = vadd.f32 %v1001_v1, %v2872_v37  ;;  %v1003_v17 = vpop.f32.mrb[55].mxu0  ;;  %v1163_v18 = vpop.f32.mrb[55].mxu1 }
 0x1ef   : > { %3613 = vst [vmem:[#allocation23_spill] sm:$0xff] %v3194_v3  ;;  %1302 = vst [vmem:[%s2880_s23 + $0x3a0] sm:$0xff] %v3188_v59  ;;  %v1408_v21 = vadd.f32 %v1407_v31, %v1000_v61  ;;  %v1611_v23 = vmul.f32 %v1000_v61, %v1000_v61  ;;  %v1744_v24 = vmul.f32 %v1000_v61, %v998_v43  ;;  %v2383_v59 = vld [vmem:[%s2880_s23 + $0x218] sm:$0xff] }
 0x1f0   : > { %1239 = vst [vmem:[%s2880_s23 + $0x1a8] sm:$0xff] %v1000_v61  ;;  %v1004_v27 = vadd.f32 %v1003_v17, %v2874_v38  ;;  %1303 = vst [vmem:[%s2880_s23 + $0x3a8] sm:$0xff] %v3194_v3  ;;  %v1541_v28 = vadd.f32 %v1540_v36, %v1478_v12  ;;  %v1340_v29 = vadd.f32 %v1339_v11, %v1002_v15 }
 0x1f1   : > { %1240 = vst [vmem:[%s2880_s23 + $0x1b0] sm:$0xff] %v1002_v15  ;;  %v1479_v26 = vmul.f32 %v1002_v15, %v1002_v15  ;;  %v1674_v32 = vadd.f32 %v1673_v46, %v1611_v23  ;;  %v1807_v41 = vadd.f32 %v1806_v55, %v1744_v24  ;;  %v3207_v31 = vadd.f32 %v1161_v8, %v2872_v37 }
 0x1f2   : > { %1241 = vst [vmem:[%s2880_s23 + $0x1b8] sm:$0xff] %v1004_v27  ;;  %v1409_v50 = vadd.f32 %v1408_v21, %v1004_v27  ;;  %v1612_v53 = vmul.f32 %v1004_v27, %v1004_v27  ;;  %v1745_v60 = vmul.f32 %v1004_v27, %v1002_v15  ;;  %v3210_v36 = vadd.f32 %v1163_v18, %v2874_v38 }
 0x1f3   : > { %v1542_v51 = vadd.f32 %v1541_v28, %v1479_v26  ;;  %3614 = vst [vmem:[#allocation24_spill] sm:$0xff] %v3207_v31  ;;  %v1007_v61 = vpop.f32.mrb[56].mxu0  ;;  %v1167_v1 = vpop.f32.mrb[56].mxu1  ;;  %1304 = vst [vmem:[%s2880_s23 + $0x3b0] sm:$0xff] %v3207_v31  ;;  %v1618_v40 = vmul.f32 %v2383_v59, %v2383_v59 }
 0x1f4   : > { %v1675_v43 = vadd.f32 %v1674_v32, %v1612_v53  ;;  %3615 = vst [vmem:[#allocation25_spill] sm:$0xff] %v3210_v36  ;;  %v1808_v11 = vadd.f32 %v1807_v41, %v1745_v60  ;;  %v1008_v46 = vadd.f32 %v1007_v61, %v2872_v37  ;;  %v1009_v55 = vpop.f32.mrb[57].mxu0  ;;  %v3216_v12 = vadd.f32 %v1167_v1, %v2872_v37  ;;  %v1169_v8 = vpop.f32.mrb[57].mxu1 }
 0x1f5   : > { %v1010_v15 = vadd.f32 %v1009_v55, %v2874_v38  ;;  %v1011_v17 = vpop.f32.mrb[58].mxu0  ;;  %1305 = vst [vmem:[%s2880_s23 + $0x3b8] sm:$0xff] %v3210_v36  ;;  %v3222_v18 = vadd.f32 %v1169_v8, %v2874_v38  ;;  %v1171_v21 = vpop.f32.mrb[58].mxu1 }
 0x1f6   : > { %3616 = vst [vmem:[#allocation26_spill] sm:$0xff] %v3216_v12  ;;  %1242 = vst [vmem:[%s2880_s23 + $0x1c0] sm:$0xff] %v1008_v46  ;;  %v1341_v23 = vadd.f32 %v1340_v29, %v1008_v46  ;;  %v1480_v24 = vmul.f32 %v1008_v46, %v1008_v46  ;;  %v1012_v27 = vadd.f32 %v1011_v17, %v2872_v37  ;;  %v1013_v28 = vpop.f32.mrb[59].mxu0  ;;  %v1173_v26 = vpop.f32.mrb[59].mxu1 }
 0x1f7   : > { %3617 = vst [vmem:[#allocation27_spill] sm:$0xff] %v3222_v18  ;;  %1306 = vst [vmem:[%s2880_s23 + $0x3c0] sm:$0xff] %v3216_v12  ;;  %v1410_v32 = vadd.f32 %v1409_v50, %v1010_v15  ;;  %v1613_v41 = vmul.f32 %v1010_v15, %v1010_v15  ;;  %v1746_v53 = vmul.f32 %v1010_v15, %v1008_v46  ;;  %v2380_v46 = vld [vmem:[%s2880_s23 + $0x200] sm:$0xff] }
 0x1f8   : > { %1243 = vst [vmem:[%s2880_s23 + $0x1c8] sm:$0xff] %v1010_v15  ;;  %v1014_v60 = vadd.f32 %v1013_v28, %v2874_v38  ;;  %1307 = vst [vmem:[%s2880_s23 + $0x3c8] sm:$0xff] %v3222_v18  ;;  %v1543_v61 = vadd.f32 %v1542_v51, %v1480_v24  ;;  %v1342_v29 = vadd.f32 %v1341_v23, %v1012_v27 }
 0x1f9   : > { %1244 = vst [vmem:[%s2880_s23 + $0x1d0] sm:$0xff] %v1012_v27  ;;  %v1481_v1 = vmul.f32 %v1012_v27, %v1012_v27  ;;  %v1676_v55 = vadd.f32 %v1675_v43, %v1613_v41  ;;  %v1809_v8 = vadd.f32 %v1808_v11, %v1746_v53  ;;  %v3235_v31 = vadd.f32 %v1171_v21, %v2872_v37  ;;  %v2381_v43 = vld [vmem:[%s2880_s23 + $0x208] sm:$0xff] }
 0x1fa   : > { %1245 = vst [vmem:[%s2880_s23 + $0x1d8] sm:$0xff] %v1014_v60  ;;  %v1411_v17 = vadd.f32 %v1410_v32, %v1014_v60  ;;  %v1614_v12 = vmul.f32 %v1014_v60, %v1014_v60  ;;  %v1747_v50 = vmul.f32 %v1014_v60, %v1012_v27  ;;  %v1484_v15 = vmul.f32 %v2380_v46, %v2380_v46 }
 0x1fb   : > { %v1544_v36 = vadd.f32 %v1543_v61, %v1481_v1  ;;  %3618 = vst [vmem:[#allocation28_spill] sm:$0xff] %v3235_v31  ;;  %v1017_v51 = vpop.f32.mrb[60].mxu0  ;;  %v3239_v23 = vadd.f32 %v1173_v26, %v2874_v38  ;;  %v1177_v24 = vpop.f32.mrb[60].mxu1  ;;  %v1617_v11 = vmul.f32 %v2381_v43, %v2381_v43  ;;  %1308 = vst [vmem:[%s2880_s23 + $0x3d0] sm:$0xff] %v3235_v31 }
 0x1fc   : > { %v1677_v28 = vadd.f32 %v1676_v55, %v1614_v12  ;;  %v1810_v32 = vadd.f32 %v1809_v8, %v1747_v50  ;;  %v1018_v41 = vadd.f32 %v1017_v51, %v2872_v37  ;;  %v1019_v27 = vpop.f32.mrb[61].mxu0  ;;  %v3246_v21 = vadd.f32 %v1177_v24, %v2872_v37  ;;  %v1179_v12 = vpop.f32.mrb[61].mxu1  ;;  %v2382_v8 = vld [vmem:[%s2880_s23 + $0x210] sm:$0xff] }
 0x1fd   : > { %3619 = vst [vmem:[#allocation29_spill] sm:$0xff] %v3239_v23  ;;  %v1750_v53 = vmul.f32 %v2381_v43, %v2380_v46  ;;  %v1020_v26 = vadd.f32 %v1019_v27, %v2874_v38  ;;  %v1021_v60 = vpop.f32.mrb[62].mxu0  ;;  %1309 = vst [vmem:[%s2880_s23 + $0x3d8] sm:$0xff] %v3239_v23  ;;  %v3253_v61 = vmul.f32 %v3239_v23, %v3235_v31  ;;  %v1181_v55 = vpop.f32.mrb[62].mxu1 }
 0x1fe   : > { %v3256_v1 = vadd.f32 %v1179_v12, %v2874_v38  ;;  %v1485_v50 = vmul.f32 %v2382_v8, %v2382_v8  ;;  %1246 = vst [vmem:[%s2880_s23 + $0x1e0] sm:$0xff] %v1018_v41  ;;  %v1343_v51 = vadd.f32 %v1342_v29, %v1018_v41  ;;  %v1482_v24 = vmul.f32 %v1018_v41, %v1018_v41  ;;  %v1023_v18 = vpop.f32.mrb[63].mxu0  ;;  %v1183_v23 = vpop.f32.mrb[63].mxu1 }
 0x1ff   : > { %3620 = vst [vmem:[#allocation30_spill] sm:$0xff] %v3253_v61  ;;  %v1022_v27 = vadd.f32 %v1021_v60, %v2872_v37  ;;  %1310 = vst [vmem:[%s2880_s23 + $0x3e0] sm:$0xff] %v3246_v21  ;;  %v1412_v61 = vadd.f32 %v1411_v17, %v1020_v26  ;;  %v1615_v12 = vmul.f32 %v1020_v26, %v1020_v26 }
 0x200   : > { %1247 = vst [vmem:[%s2880_s23 + $0x1e8] sm:$0xff] %v1020_v26  ;;  %v1748_v31 = vmul.f32 %v1020_v26, %v1018_v41  ;;  %v1024_v3 = vadd.f32 %v1023_v18, %v2874_v38  ;;  %1311 = vst [vmem:[%s2880_s23 + $0x3e8] sm:$0xff] %v3256_v1  ;;  %v1545_v33 = vadd.f32 %v1544_v36, %v1482_v24 }
 0x201   : > { %1248 = vst [vmem:[%s2880_s23 + $0x1f0] sm:$0xff] %v1022_v27  ;;  %v1344_v29 = vadd.f32 %v1343_v51, %v1022_v27  ;;  %v1483_v63 = vmul.f32 %v1022_v27, %v1022_v27  ;;  %v1678_v60 = vadd.f32 %v1677_v28, %v1615_v12  ;;  %v3272_v18 = vmul.f32 %v3256_v1, %v3246_v21 }
 0x202   : > { %v1811_v57 = vadd.f32 %v1810_v32, %v1748_v31  ;;  %1249 = vst [vmem:[%s2880_s23 + $0x1f8] sm:$0xff] %v1024_v3  ;;  %v1413_v47 = vadd.f32 %v1412_v61, %v1024_v3  ;;  %v1616_v42 = vmul.f32 %v1024_v3, %v1024_v3  ;;  %v1749_v41 = vmul.f32 %v1024_v3, %v1022_v27  ;;  %v2385_v61 = vld [vmem:[%s2880_s23 + $0x228] sm:$0xff] }
 0x203   : > { %v1345_v17 = vadd.f32 %v2380_v46, %v1344_v29  ;;  %v1546_v7 = vadd.f32 %v1545_v33, %v1483_v63  ;;  %v3275_v51 = vadd.f32 %v1181_v55, %v2872_v37  ;;  %v3278_v31 = vadd.f32 %v1183_v23, %v2874_v38  ;;  %v2384_v33 = vld [vmem:[%s2880_s23 + $0x220] sm:$0xff] }
 0x204   : > { %v1414_v36 = vadd.f32 %v2381_v43, %v1413_v47  ;;  %v1679_v26 = vadd.f32 %v1678_v60, %v1616_v42  ;;  %v1751_v28 = vmul.f32 %v2383_v59, %v2382_v8  ;;  %v1812_v63 = vadd.f32 %v1811_v57, %v1749_v41  ;;  %v2386_v57 = vld [vmem:[%s2880_s23 + $0x230] sm:$0xff] }
 0x205   : > { %v1346_v32 = vadd.f32 %v2382_v8, %v1345_v17  ;;  %v1547_v46 = vadd.f32 %v1546_v7, %v1484_v15  ;;  %v1486_v3 = vmul.f32 %v2384_v33, %v2384_v33  ;;  %v1619_v24 = vmul.f32 %v2385_v61, %v2385_v61  ;;  %1312 = vst [vmem:[%s2880_s23 + $0x3f0] sm:$0xff] %v3275_v51 }
 0x206   : > { %v1415_v27 = vadd.f32 %v2383_v59, %v1414_v36  ;;  %v1680_v12 = vadd.f32 %v1679_v26, %v1617_v11  ;;  %1313 = vst [vmem:[%s2880_s23 + $0x3f8] sm:$0xff] %v3278_v31  ;;  %v1813_v42 = vadd.f32 %v1812_v63, %v1750_v53  ;;  %v3288_v47 = vmul.f32 %v3278_v31, %v3275_v51  ;;  %v2387_v59 = vld [vmem:[%s2880_s23 + $0x238] sm:$0xff]  ;;  %v2389_v36 = vld [vmem:[%s2880_s23 + $0x248] sm:$0xff] }
 0x207   : > { %v1347_v37 = vadd.f32 %v2384_v33, %v1346_v32  ;;  %v1548_v38 = vadd.f32 %v1547_v46, %v1485_v50  ;;  %v1752_v7 = vmul.f32 %v2385_v61, %v2384_v33  ;;  %v1487_v15 = vmul.f32 %v2386_v57, %v2386_v57  ;;  %v2388_v50 = vld [vmem:[%s2880_s23 + $0x240] sm:$0xff]  ;;  %v2390_v33 = vld [vmem:[%s2880_s23 + $0x250] sm:$0xff] }
 0x208   : > { %v1416_v23 = vadd.f32 %v2385_v61, %v1415_v27  ;;  %v1681_v43 = vadd.f32 %v1680_v12, %v1618_v40  ;;  %v1620_v11 = vmul.f32 %v2387_v59, %v2387_v59  ;;  %v1814_v29 = vadd.f32 %v1813_v42, %v1751_v28 }
 0x209   : > { %v1348_v55 = vadd.f32 %v2386_v57, %v1347_v37  ;;  %v1549_v8 = vadd.f32 %v1548_v38, %v1486_v3  ;;  %v1753_v60 = vmul.f32 %v2387_v59, %v2386_v57  ;;  %v1488_v53 = vmul.f32 %v2388_v50, %v2388_v50  ;;  %v2391_v3 = vld [vmem:[%s2880_s23 + $0x258] sm:$0xff]  ;;  %v2392_v57 = vld [vmem:[%s2880_s23 + $0x260] sm:$0xff] }
 0x20a   : > { %v1417_v17 = vadd.f32 %v2387_v59, %v1416_v23  ;;  %v1682_v41 = vadd.f32 %v1681_v43, %v1619_v24  ;;  %v1621_v26 = vmul.f32 %v2389_v36, %v2389_v36  ;;  %v1815_v63 = vadd.f32 %v1814_v29, %v1752_v7 }
 0x20b   : > { %v1349_v32 = vadd.f32 %v2388_v50, %v1348_v55  ;;  %v1550_v46 = vadd.f32 %v1549_v8, %v1487_v15  ;;  %v1754_v40 = vmul.f32 %v2389_v36, %v2388_v50  ;;  %v1489_v61 = vmul.f32 %v2390_v33, %v2390_v33  ;;  %v2393_v15 = vld [vmem:[%s2880_s23 + $0x268] sm:$0xff]  ;;  %v2394_v50 = vld [vmem:[%s2880_s23 + $0x270] sm:$0xff] }
 0x20c   : > { %v1418_v27 = vadd.f32 %v2389_v36, %v1417_v17  ;;  %v1683_v12 = vadd.f32 %v1682_v41, %v1620_v11  ;;  %v1622_v28 = vmul.f32 %v2391_v3, %v2391_v3  ;;  %v1816_v42 = vadd.f32 %v1815_v63, %v1753_v60 }
 0x20d   : > { %v1350_v37 = vadd.f32 %v2390_v33, %v1349_v32  ;;  %v1551_v38 = vadd.f32 %v1550_v46, %v1488_v53  ;;  %v1755_v24 = vmul.f32 %v2391_v3, %v2390_v33  ;;  %v1490_v23 = vmul.f32 %v2392_v57, %v2392_v57  ;;  %v2395_v53 = vld [vmem:[%s2880_s23 + $0x278] sm:$0xff] }
 0x20e   : > { %v1419_v43 = vadd.f32 %v2391_v3, %v1418_v27  ;;  %v1684_v59 = vadd.f32 %v1683_v12, %v1621_v26  ;;  %v1623_v7 = vmul.f32 %v2393_v15, %v2393_v15  ;;  %v1817_v29 = vadd.f32 %v1816_v42, %v1754_v40  ;;  %v2396_v26 = vld [vmem:[%s2880_s23 + $0x280] sm:$0xff] }
 0x20f   : > { %v1351_v55 = vadd.f32 %v2392_v57, %v1350_v37  ;;  %v1552_v8 = vadd.f32 %v1551_v38, %v1489_v61  ;;  %v1756_v11 = vmul.f32 %v2393_v15, %v2392_v57  ;;  %v1491_v17 = vmul.f32 %v2394_v50, %v2394_v50  ;;  %v2397_v37 = vld [vmem:[%s2880_s23 + $0x288] sm:$0xff] }
 0x210   : > { %v1420_v41 = vadd.f32 %v2393_v15, %v1419_v43  ;;  %v1685_v36 = vadd.f32 %v1684_v59, %v1622_v28  ;;  %v1624_v60 = vmul.f32 %v2395_v53, %v2395_v53  ;;  %v1818_v63 = vadd.f32 %v1817_v29, %v1755_v24  ;;  %v2398_v15 = vld [vmem:[%s2880_s23 + $0x290] sm:$0xff] }
 0x211   : > { %v1352_v32 = vadd.f32 %v2394_v50, %v1351_v55  ;;  %v1553_v46 = vadd.f32 %v1552_v8, %v1490_v23  ;;  %v1757_v33 = vmul.f32 %v2395_v53, %v2394_v50  ;;  %v1492_v27 = vmul.f32 %v2396_v26, %v2396_v26 }
 0x212   : > { %v1421_v12 = vadd.f32 %v2395_v53, %v1420_v41  ;;  %v1686_v3 = vadd.f32 %v1685_v36, %v1623_v7  ;;  %v1625_v61 = vmul.f32 %v2397_v37, %v2397_v37  ;;  %v1819_v38 = vadd.f32 %v1818_v63, %v1756_v11 }
 0x213   : > { %v1554_v40 = vadd.f32 %v1553_v46, %v1491_v17  ;;  %v1353_v42 = vadd.f32 %v2396_v26, %v1352_v32  ;;  %v1758_v57 = vmul.f32 %v2397_v37, %v2396_v26  ;;  %v1493_v28 = vmul.f32 %v2955_v2, %v2955_v2 }
 0x214   : > { %v1687_v43 = vadd.f32 %v1686_v3, %v1624_v60  ;;  %v1422_v59 = vadd.f32 %v2397_v37, %v1421_v12  ;;  %v1626_v24 = vmul.f32 %v2958_v5, %v2958_v5  ;;  %v1820_v23 = vadd.f32 %v1819_v38, %v1757_v33 }
 0x215   : > { %v1354_v55 = vadd.f32 %v2398_v15, %v1353_v42  ;;  %v1555_v8 = vadd.f32 %v1554_v40, %v1492_v27  ;;  %v1759_v7 = vmul.f32 %v2398_v15, %v2958_v5  ;;  %v1494_v29 = vmul.f32 %v2964_v10, %v2964_v10 }
 0x216   : > { %v1423_v11 = vadd.f32 %v1422_v59, %v2958_v5  ;;  %v1688_v50 = vadd.f32 %v1687_v43, %v1625_v61  ;;  %v1627_v2 = vmul.f32 %v2970_v14, %v2970_v14  ;;  %v1821_v36 = vadd.f32 %v1820_v23, %v1758_v57 }
 0x217   : > { %v1355_v17 = vadd.f32 %v1354_v55, %v2964_v10  ;;  %v1556_v41 = vadd.f32 %v1555_v8, %v1493_v28  ;;  %v1760_v53 = vmul.f32 %v2970_v14, %v2964_v10  ;;  %v1495_v60 = vmul.f32 %v2983_v34, %v2983_v34 }
 0x218   : > { %v1424_v32 = vadd.f32 %v1423_v11, %v2970_v14  ;;  %v1689_v46 = vadd.f32 %v1688_v50, %v1626_v24  ;;  %v1628_v5 = vmul.f32 %v2986_v39, %v2986_v39  ;;  %v1822_v26 = vadd.f32 %v1821_v36, %v1759_v7 }
 0x219   : > { %v1356_v63 = vadd.f32 %v1355_v17, %v2983_v34  ;;  %v1557_v33 = vadd.f32 %v1556_v41, %v1494_v29  ;;  %v1761_v27 = vmul.f32 %v2986_v39, %v2983_v34  ;;  %v1496_v12 = vmul.f32 %v2992_v44, %v2992_v44 }
 0x21a   : > { %v1425_v10 = vadd.f32 %v1424_v32, %v2986_v39  ;;  %v1690_v3 = vadd.f32 %v1689_v46, %v1627_v2  ;;  %v1629_v14 = vmul.f32 %v2998_v48, %v2998_v48  ;;  %v1823_v40 = vadd.f32 %v1822_v26, %v1760_v53 }
 0x21b   : > { %v1357_v37 = vadd.f32 %v1356_v63, %v2992_v44  ;;  %v1558_v61 = vadd.f32 %v1557_v33, %v1495_v60  ;;  %v1762_v38 = vmul.f32 %v2998_v48, %v2992_v44  ;;  %v1497_v42 = vmul.f32 %v3011_v6, %v3011_v6 }
 0x21c   : > { %v1426_v34 = vadd.f32 %v1425_v10, %v2998_v48  ;;  %v1691_v57 = vadd.f32 %v1690_v3, %v1628_v5  ;;  %v1630_v39 = vmul.f32 %v3014_v9, %v3014_v9  ;;  %v1824_v59 = vadd.f32 %v1823_v40, %v1761_v27 }
 0x21d   : > { %v1358_v28 = vadd.f32 %v1357_v37, %v3011_v6  ;;  %v1559_v43 = vadd.f32 %v1558_v61, %v1496_v12  ;;  %v1763_v24 = vmul.f32 %v3014_v9, %v3011_v6  ;;  %v1498_v23 = vmul.f32 %v3020_v16, %v3020_v16 }
 0x21e   : > { %v1427_v44 = vadd.f32 %v1426_v34, %v3014_v9  ;;  %v1692_v15 = vadd.f32 %v1691_v57, %v1629_v14  ;;  %v1631_v48 = vmul.f32 %v3026_v20, %v3026_v20  ;;  %v1825_v7 = vadd.f32 %v1824_v59, %v1762_v38 }
 0x21f   : > { %v1359_v55 = vadd.f32 %v1358_v28, %v3020_v16  ;;  %v1560_v8 = vadd.f32 %v1559_v43, %v1497_v42  ;;  %v1764_v29 = vmul.f32 %v3026_v20, %v3020_v16  ;;  %v1499_v11 = vmul.f32 %v3039_v45, %v3039_v45 }
 0x220   : > { %v1428_v6 = vadd.f32 %v1427_v44, %v3026_v20  ;;  %v1693_v50 = vadd.f32 %v1692_v15, %v1630_v39  ;;  %v1632_v9 = vmul.f32 %v3042_v49, %v3042_v49  ;;  %v1826_v41 = vadd.f32 %v1825_v7, %v1763_v24 }
 0x221   : > { %v1360_v2 = vadd.f32 %v1359_v55, %v3039_v45  ;;  %v1561_v17 = vadd.f32 %v1560_v8, %v1498_v23  ;;  %v1765_v36 = vmul.f32 %v3042_v49, %v3039_v45  ;;  %v1500_v53 = vmul.f32 %v3048_v54, %v3048_v54 }
 0x222   : > { %v1429_v16 = vadd.f32 %v1428_v6, %v3042_v49  ;;  %v1694_v60 = vadd.f32 %v1693_v50, %v1631_v48  ;;  %v1633_v46 = vmul.f32 %v3054_v58, %v3054_v58  ;;  %v1827_v5 = vadd.f32 %v1826_v41, %v1764_v29 }
 0x223   : > { %v1361_v32 = vadd.f32 %v1360_v2, %v3048_v54  ;;  %v1562_v20 = vadd.f32 %v1561_v17, %v1499_v11  ;;  %v1766_v26 = vmul.f32 %v3054_v58, %v3048_v54  ;;  %v1501_v45 = vmul.f32 %v3067_v22, %v3067_v22 }
 0x224   : > { %v1430_v63 = vadd.f32 %v1429_v16, %v3054_v58  ;;  %v1695_v33 = vadd.f32 %v1694_v60, %v1632_v9  ;;  %v1828_v12 = vadd.f32 %v1827_v5, %v1765_v36  ;;  %v1634_v10 = vmul.f32 %v3070_v25, %v3070_v25  ;;  %v3621_v36 = vld [vmem:[#allocation15_spill] sm:$0xff] }
 0x225   : > { %v1563_v27 = vadd.f32 %v1562_v20, %v1500_v53  ;;  %v1362_v49 = vadd.f32 %v1361_v32, %v3067_v22  ;;  %v1767_v37 = vmul.f32 %v3070_v25, %v3067_v22  ;;  %v1502_v61 = vmul.f32 %v3076_v30, %v3076_v30  ;;  %v3622_v20 = vld [vmem:[#allocation16_spill] sm:$0xff] }
 0x226   : > { %v1696_v3 = vadd.f32 %v1695_v33, %v1633_v46  ;;  %v1431_v14 = vadd.f32 %v1430_v63, %v3070_v25  ;;  %v1829_v54 = vadd.f32 %v1828_v12, %v1766_v26  ;;  %v1635_v38 = vmul.f32 %v3082_v35, %v3082_v35  ;;  %v3623_v63 = vld [vmem:[#allocation17_spill] sm:$0xff]  ;;  %v3624_v12 = vld [vmem:[#allocation18_spill] sm:$0xff] }
 0x227   : > { %v1564_v58 = vadd.f32 %v1563_v27, %v1501_v45  ;;  %v1363_v40 = vadd.f32 %v1362_v49, %v3076_v30  ;;  %v1768_v57 = vmul.f32 %v3082_v35, %v3076_v30  ;;  %v1503_v39 = vmul.f32 %v3095_v0, %v3095_v0 }
 0x228   : > { %v1697_v42 = vadd.f32 %v1696_v3, %v1634_v10  ;;  %v1432_v34 = vadd.f32 %v1431_v14, %v3082_v35  ;;  %v1830_v22 = vadd.f32 %v1829_v54, %v1767_v37  ;;  %v1636_v43 = vmul.f32 %v3098_v4, %v3098_v4  ;;  %v3625_v14 = vld [vmem:[#allocation19_spill] sm:$0xff] }
 0x229   : > { %v1565_v25 = vadd.f32 %v1564_v58, %v1502_v61  ;;  %v1364_v28 = vadd.f32 %v1363_v40, %v3095_v0  ;;  %v1769_v23 = vmul.f32 %v3098_v4, %v3095_v0  ;;  %v1504_v44 = vmul.f32 %v3104_v13, %v3104_v13  ;;  %v3626_v40 = vld [vmem:[#allocation20_spill] sm:$0xff] }
 0x22a   : > { %v1698_v59 = vadd.f32 %v1697_v42, %v1635_v38  ;;  %v1433_v24 = vadd.f32 %v1432_v34, %v3098_v4  ;;  %v1831_v30 = vadd.f32 %v1830_v22, %v1768_v57  ;;  %v1637_v48 = vmul.f32 %v3110_v19, %v3110_v19 }
 0x22b   : > { %v1566_v35 = vadd.f32 %v1565_v25, %v1503_v39  ;;  %v1365_v15 = vadd.f32 %v1364_v28, %v3104_v13  ;;  %v1770_v7 = vmul.f32 %v3110_v19, %v3104_v13  ;;  %v1505_v29 = vmul.f32 %v3123_v52, %v3123_v52  ;;  %v3627_v39 = vld [vmem:[#allocation21_spill] sm:$0xff] }
 0x22c   : > { %v1699_v55 = vadd.f32 %v1698_v59, %v1636_v43  ;;  %v1434_v8 = vadd.f32 %v1433_v24, %v3110_v19  ;;  %v1832_v0 = vadd.f32 %v1831_v30, %v1769_v23  ;;  %v1638_v6 = vmul.f32 %v3126_v56, %v3126_v56  ;;  %v3628_v59 = vld [vmem:[#allocation22_spill] sm:$0xff] }
 0x22d   : > { %v1567_v4 = vadd.f32 %v1566_v35, %v1504_v44  ;;  %v1366_v11 = vadd.f32 %v1365_v15, %v3123_v52  ;;  %v1771_v2 = vmul.f32 %v3126_v56, %v3123_v52  ;;  %v1506_v17 = vmul.f32 %v3132_v62, %v3132_v62  ;;  %v3629_v35 = vld [vmem:[#allocation23_spill] sm:$0xff] }
 0x22e   : > { %v1700_v50 = vadd.f32 %v1699_v55, %v1637_v48  ;;  %v1435_v9 = vadd.f32 %v1434_v8, %v3126_v56  ;;  %v1833_v13 = vadd.f32 %v1832_v0, %v1770_v7  ;;  %v1639_v53 = vmul.f32 %v3621_v36, %v3621_v36  ;;  %v3630_v7 = vld [vmem:[#allocation24_spill] sm:$0xff] }
 0x22f   : > { %v1568_v19 = vadd.f32 %v1567_v4, %v1505_v29  ;;  %v1367_v41 = vadd.f32 %v1366_v11, %v3132_v62  ;;  %v1772_v32 = vmul.f32 %v3621_v36, %v3132_v62  ;;  %v1507_v46 = vmul.f32 %v3622_v20, %v3622_v20 }
 0x230   : > { %v1701_v16 = vadd.f32 %v1700_v50, %v1638_v6  ;;  %v1436_v60 = vadd.f32 %v1435_v9, %v3621_v36  ;;  %v1834_v52 = vadd.f32 %v1833_v13, %v1771_v2  ;;  %v1640_v33 = vmul.f32 %v3623_v63, %v3623_v63  ;;  %v3631_v6 = vld [vmem:[#allocation25_spill] sm:$0xff]  ;;  %v3632_v13 = vld [vmem:[#allocation26_spill] sm:$0xff] }
 0x231   : > { %v1569_v56 = vadd.f32 %v1568_v19, %v1506_v17  ;;  %v1368_v5 = vadd.f32 %v1367_v41, %v3622_v20  ;;  %v1773_v27 = vmul.f32 %v3623_v63, %v3622_v20  ;;  %v1508_v49 = vmul.f32 %v3624_v12, %v3624_v12 }
 0x232   : > { %v1702_v26 = vadd.f32 %v1701_v16, %v1639_v53  ;;  %v1437_v45 = vadd.f32 %v1436_v60, %v3623_v63  ;;  %v1835_v62 = vadd.f32 %v1834_v52, %v1772_v32  ;;  %v1641_v37 = vmul.f32 %v3625_v14, %v3625_v14  ;;  %v3633_v16 = vld [vmem:[#allocation27_spill] sm:$0xff]  ;;  %v3634_v52 = vld [vmem:[#allocation28_spill] sm:$0xff] }
 0x233   : > { %v1570_v10 = vadd.f32 %v1569_v56, %v1507_v46  ;;  %v1369_v3 = vadd.f32 %v1368_v5, %v3624_v12  ;;  %v1774_v58 = vmul.f32 %v3625_v14, %v3624_v12  ;;  %v1509_v38 = vmul.f32 %v3626_v40, %v3626_v40 }
 0x234   : > { %v1703_v61 = vadd.f32 %v1702_v26, %v1640_v33  ;;  %v1438_v54 = vadd.f32 %v1437_v45, %v3625_v14  ;;  %v1836_v42 = vadd.f32 %v1835_v62, %v1773_v27  ;;  %v1642_v22 = vmul.f32 %v3627_v39, %v3627_v39  ;;  %v3635_v27 = vld [vmem:[#allocation29_spill] sm:$0xff] }
 0x235   : > { %v1571_v34 = vadd.f32 %v1570_v10, %v1508_v49  ;;  %v1370_v57 = vadd.f32 %v1369_v3, %v3626_v40  ;;  %v1775_v43 = vmul.f32 %v3627_v39, %v3626_v40  ;;  %v1510_v24 = vmul.f32 %v3628_v59, %v3628_v59 }
 0x236   : > { %v1704_v25 = vadd.f32 %v1703_v61, %v1641_v37  ;;  %v1439_v28 = vadd.f32 %v1438_v54, %v3627_v39  ;;  %v1837_v23 = vadd.f32 %v1836_v42, %v1774_v58  ;;  %v1643_v15 = vmul.f32 %v3629_v35, %v3629_v35  ;;  %v3636_v54 = vld [vmem:[#allocation30_spill] sm:$0xff] }
 0x237   : > { %v1572_v44 = vadd.f32 %v1571_v34, %v1509_v38  ;;  %v1371_v30 = vadd.f32 %v1370_v57, %v3628_v59  ;;  %v1776_v8 = vmul.f32 %v3629_v35, %v3628_v59  ;;  %v1511_v29 = vmul.f32 %v3630_v7, %v3630_v7 }
 0x238   : > { %v1705_v48 = vadd.f32 %v1704_v25, %v1642_v22  ;;  %v1440_v55 = vadd.f32 %v1439_v28, %v3629_v35  ;;  %v1838_v0 = vadd.f32 %v1837_v23, %v1775_v43  ;;  %v1644_v50 = vmul.f32 %v3631_v6, %v3631_v6 }
 0x239   : > { %v1573_v4 = vadd.f32 %v1572_v44, %v1510_v24  ;;  %v1372_v11 = vadd.f32 %v1371_v30, %v3630_v7  ;;  %v1777_v17 = vmul.f32 %v3631_v6, %v3630_v7  ;;  %v1512_v19 = vmul.f32 %v3632_v13, %v3632_v13 }
 0x23a   : > { %v1706_v9 = vadd.f32 %v1705_v48, %v1643_v15  ;;  %v1441_v2 = vadd.f32 %v1440_v55, %v3631_v6  ;;  %v1839_v41 = vadd.f32 %v1838_v0, %v1776_v8  ;;  %v1645_v60 = vmul.f32 %v3633_v16, %v3633_v16 }
 0x23b   : > { %v1574_v36 = vadd.f32 %v1573_v4, %v1511_v29  ;;  %v1373_v53 = vadd.f32 %v1372_v11, %v3632_v13  ;;  %v1778_v46 = vmul.f32 %v3633_v16, %v3632_v13  ;;  %v1513_v56 = vmul.f32 %v3634_v52, %v3634_v52 }
 0x23c   : > { %v1707_v32 = vadd.f32 %v1706_v9, %v1644_v50  ;;  %v1442_v20 = vadd.f32 %v1441_v2, %v3633_v16  ;;  %v1840_v5 = vadd.f32 %v1839_v41, %v1777_v17  ;;  %v1514_v26 = vmul.f32 %v3246_v21, %v3246_v21 }
 0x23d   : > { %v1575_v63 = vadd.f32 %v1574_v36, %v1512_v19  ;;  %v1374_v33 = vadd.f32 %v1373_v53, %v3634_v52  ;;  %v1646_v49 = vmul.f32 %v3635_v27, %v3635_v27  ;;  %v1647_v62 = vmul.f32 %v3256_v1, %v3256_v1 }
 0x23e   : > { %v1708_v45 = vadd.f32 %v1707_v32, %v1645_v60  ;;  %v1443_v12 = vadd.f32 %v1442_v20, %v3635_v27  ;;  %v1841_v10 = vadd.f32 %v1840_v5, %v1778_v46  ;;  %v1515_v42 = vmul.f32 %v3275_v51, %v3275_v51 }
 0x23f   : > { %v1576_v3 = vadd.f32 %v1575_v63, %v1513_v56  ;;  %v1375_v14 = vadd.f32 %v1374_v33, %v3246_v21  ;;  %v1648_v39 = vmul.f32 %v3278_v31, %v3278_v31  ;;  %v2592_v56 = vmov (!%p3637_p2), 0.0  }
 0x240   : > { %v1709_v37 = vadd.f32 %v1708_v45, %v1646_v49  ;;  %v1444_v61 = vadd.f32 %v1443_v12, %v3256_v1  ;;  %v1842_v58 = vadd.f32 %v1841_v10, %v3636_v54  ;;  %1869 = vst [vmem:[#allocation9] sm:$0xff] (!%p3637_p2), %v2592_v56 }
 0x241   : > { %v1577_v40 = vadd.f32 %v1576_v3, %v1514_v26  ;;  %v1376_v38 = vadd.f32 %v1375_v14, %v3275_v51 }
 0x242   : > { %v1710_v34 = vadd.f32 %v1709_v37, %v1647_v62  ;;  %v1445_v57 = vadd.f32 %v1444_v61, %v3278_v31  ;;  %v1843_v22 = vadd.f32 %v1842_v58, %v3272_v18 }
 0x243   : > { %v1377_v21 = vrot.slane %v1376_v38, 4  ;;  %v1578_v25 = vadd.f32 %v1577_v40, %v1515_v42 }
 0x244   : > { %v1446_v28 = vrot.slane %v1445_v57, 4  ;;  %v1711_v1 = vadd.f32 %v1710_v34, %v1648_v39  ;;  %v1844_v24 = vadd.f32 %v1843_v22, %v3288_v47 }
 0x245   : > { %v1378_v43 = vadd.f32 %v1377_v21, %v1376_v38  ;;  %v1579_v59 = vrot.slane %v1578_v25, 4 }
 0x246   : > { %v1447_v23 = vadd.f32 %v1446_v28, %v1445_v57  ;;  %v1712_v44 = vrot.slane %v1711_v1, 4  ;;  %v1845_v35 = vrot.slane %v1844_v24, 4 }
 0x247   : > { %v1379_v30 = vrot.slane %v1378_v43, 2  ;;  %v1580_v51 = vadd.f32 %v1579_v59, %v1578_v25 }
 0x248   : > { %v1448_v15 = vrot.slane %v1447_v23, 2  ;;  %v1713_v48 = vadd.f32 %v1712_v44, %v1711_v1  ;;  %v1846_v31 = vadd.f32 %v1845_v35, %v1844_v24 }
 0x249   : > { %v1380_v55 = vadd.f32 %v1379_v30, %v1378_v43  ;;  %v1581_v8 = vrot.slane %v1580_v51, 2 }
 0x24a   : > { %v1449_v7 = vadd.f32 %v1448_v15, %v1447_v23  ;;  %v1714_v18 = vrot.slane %v1713_v48, 2  ;;  %v1847_v4 = vrot.slane %v1846_v31, 2 }
 0x24b   : > { %v1381_v29 = vrot.slane %v1380_v55, 1  ;;  %v1582_v0 = vadd.f32 %v1581_v8, %v1580_v51 }
 0x24c   : > { %v1450_v11 = vrot.slane %v1449_v7, 1  ;;  %v1715_v6 = vadd.f32 %v1714_v18, %v1713_v48  ;;  %v1848_v47 = vadd.f32 %v1847_v4, %v1846_v31 }
 0x24d   : > { %v1382_v50 = vadd.f32 %v1381_v29, %v1380_v55  ;;  %v1583_v9 = vrot.slane %v1582_v0, 1 }
 0x24e   : > { %v1451_v2 = vadd.f32 %v1450_v11, %v1449_v7  ;;  %v1716_v17 = vrot.slane %v1715_v6, 1  ;;  %v1849_v19 = vrot.slane %v1848_v47, 1 }
 0x24f   : > { %v1584_v13 = vadd.f32 %v1583_v9, %v1582_v0 }
 0x250   : > { %v1717_v41 = vadd.f32 %v1716_v17, %v1715_v6  ;;  %v1852_v36 = vsel %vm1851_vm0, %v1382_v50, %v1451_v2  ;;  %v1850_v53 = vadd.f32 %v1849_v19, %v1848_v47  ;;  %1868 = sbr.rel (%p3637_p2) target bundleno = 599 (0x257), region = 48 }
 0x251   : > { %v1854_v16 = vsel %vm1853_vm1, %v1852_v36, %v1584_v13 }
 0x252   : > { %v1856_v60 = vsel %vm1855_vm2, %v1854_v16, %v1717_v41 }
 0x253   : > { %v1858_v32 = vsel %vm1857_vm3, %v1856_v60, %v1850_v53 }
 0x254   : > { %v1860_v20 = vsel %vm1859_vm4, %v1858_v32, 0.0 }
 0x255   : > { %v1862_v46 = vsel %vm1861_vm5, %v1860_v20, 0.0 }
 0x256   : > { %v1864_v52 = vsel %vm1863_vm6, %v1862_v46, 0.0 }
 0x257 PF: > { %v1870_v5 = vld [vmem:[#allocation9] sm:$0xff]  ;;  %s2124_s11 = sshll.u32 %s2643_s19, 14  ;;  %s1888_s25 = sshll.u32 %s2880_s23, 4  ;;  %s3491_s25 = int_to_ptr.vmem [resolvable:$true] %s1888_s25 }
 0x258   : > { %v1871_v63 = vadd.f32 %v1870_v5, %v1864_v52  ;;  %s3488_s6 = scalar_lea.hbm %s3559_s3, %s2124_s11  ;;  %s1874_s7 = scalar_lea.sflag [#allocation4], %s2793_s8 }
 0x259   : > { %s2485_s27 = scalar_lea.vmem %s3491_s25, 16384  ;;  %s2593_s20 = smov [#allocation8]  }
 0x25a   : > { %1872 = vst [vmem:[#allocation9] sm:$0xff] %v1871_v63  ;;  %p2486_p4 = scmp.ne.s32.totalorder %s3491_s25, %s2485_s27  ;;  %s2489_s29 = sshll.u32 %s2593_s20, 4  ;;  %s2490_s29 = int_to_ptr.vmem [resolvable:$false] %s2489_s29 }
 0x25b   : > { %s2491_s5 = scalar_lea.vmem %s2490_s29, 32768  ;;  %p2492_p12 = scmp.lt.s32.totalorder %s3491_s25, %s2490_s29 }
 0x25c   : > { %p2487_p8 = pnand %p2486_p4, %p2738_p6  ;;  %p2493_p3 = scmp.lt.s32.totalorder %s2491_s5, %s2485_s27 }
 0x25e   : > { %p2488_p9 = pneg %p2487_p8  ;;  %p2494_p7 = por %p2493_p3, %p2492_p12 }
 0x260   : > { %p2495_p10 = pnand %p2494_p7, %p2488_p9 }
 0x262   : > { %2498 = shalt.err (!%p2495_p10)
}
 0x263   : > { %s2499_s26 = scalar_lea.hbm %s3488_s6, 16384  ;;  %s2503_s28 = scalar_lea.hbm %s3559_s3, 65536 }
 0x264   : > { %p2500_p13 = scmp.ne.s32.totalorder %s3488_s6, %s2499_s26  ;;  %p2504_p11 = scmp.lt.u32.totalorder %s3488_s6, %s3559_s3 }
 0x265   : > { %p2505_p1 = scmp.lt.u32.totalorder %s2503_s28, %s2499_s26  ;;  %p2507_p4 = scmp.lt.u32.totalorder %s2499_s26, %s3488_s6 }
 0x266   : > { %p2501_p0 = pnand %p2500_p13, %p2738_p6 }
 0x267   : > { %p2506_p2 = por %p2505_p1, %p2504_p11 }
 0x268   : > { %p2502_p5 = pneg %p2501_p0 }
 0x269   : > { %p2508_p8 = por %p2507_p4, %p2506_p2 }
 0x26b   : > { %p2509_p9 = pnand %p2508_p8, %p2502_p5 }
 0x26d   : > { %2512 = shalt.err (!%p2509_p9)
}
 0x26e   : > { %s2594_s11 = smov 256   ;;  %s2595_s12 = smov 16  }
 0x26f   : > { %2167 = dma.vmem_to_hbm [thread:$0]  (%p2738_p6), %s3491_s25, 16384, %s3488_s6, %s1874_s7, %s2594_s11, %s2594_s11, %s2595_s12  }
 0x270   : > { %s2596_s30 = smov [#allocation9]   ;;  %p3638_p3 = scmp.eq.s32.totalorder %s2643_s19, 3 }
 0x271   : > { %s1902_s27 = sshll.u32 %s2596_s30, 4  ;;  %s1903_s27 = int_to_ptr.vmem [resolvable:$true] %s1902_s27 }
 0x272   : > { %s2513_s20 = scalar_lea.vmem %s1903_s27, 128  ;;  %p2520_p13 = scmp.lt.s32.totalorder %s1903_s27, %s1903_s27 }
 0x273   : > { %p2514_p12 = scmp.ne.s32.totalorder %s1903_s27, %s2513_s20  ;;  %p2521_p0 = scmp.lt.s32.totalorder %s2513_s20, %s2513_s20 }
 0x275   : > { %p2515_p7 = pnand %p2514_p12, %p3638_p3  ;;  %p2522_p5 = por %p2521_p0, %p2520_p13 }
 0x277   : > { %p2516_p10 = pneg %p2515_p7 }
 0x279   : > { %p2523_p11 = pnand %p2522_p5, %p2516_p10 }
 0x27b   : > { %2526 = shalt.err (!%p2523_p11)
}
 0x27c   : > { %s2527_s13 = scalar_lea.hbm %s3560_s4, 128  ;;  %p3639_p1 = pmov %p3638_p3 }
 0x27d   : > { %p2528_p6 = scmp.ne.s32.totalorder %s3560_s4, %s2527_s13  ;;  %p2533_p8 = scmp.lt.u32.totalorder %s2527_s13, %s3560_s4 }
 0x27f   : > { %p2529_p2 = pnand %p2528_p6, %p3639_p1 }
 0x281   : > { %p2530_p4 = pneg %p2529_p2 }
 0x283   : > { %p2535_p9 = pnand %p2533_p8, %p2530_p4 }
 0x285   : > { %2538 = shalt.err (!%p2535_p9)
}
 0x286   : > { %p3640_p12 = pmov %p3639_p1  ;;  %p3641_p3 = pmov %p3639_p1 }
 0x288   : > { %2169 = dma.vmem_to_hbm [thread:$0]  (%p3640_p12), %s1903_s27, 128, %s3560_s4, [#allocation10]  }
 0x289   : > { %2564 = dma.done.wait (%p3641_p3), [#allocation10], 128   ;;  %p3642_p7 = pmov %p3639_p1 }
 0x28b   : > { %2566 = vsyncadd (%p3642_p7), [#allocation10], 4294967168 }
 0x28c PF: > { %p2195_p10 = scmp.ge.s32.totalorder %s2585_s18, 2  ;;  %s1918_s24 = sand.u32 1, %s2573_s15  }
 0x28d   : > { %p3643_p13 = scmp.ne.s32.totalorder %s3595_s22, 0  ;;  %s1919_s28 = scalar_lea.sflag [#allocation4], %s1918_s24 }
 0x28f   : > { %p2185_p0 = pnand %p2195_p10, %p3643_p13 }
 0x291   : > { %2568 = dma.done.wait (!%p2185_p0), %s1919_s28, 16384  }
 0x292   : > { %2570 = vsyncadd (!%p2185_p0), %s1919_s28, 4294950912  ;;  %p20_p5 = scmp.ge.s32.totalorder %s2728_s9, 6   ;;  %s3644_s15 = smov %s2577_s16 }
 0x293   : > { %s3645_s16 = smov %s2581_s17  ;;  %s3646_s17 = smov %s2744_s14 }
 0x294   : > { %s3647_s18 = smov %s2728_s9  ;;  %22 = sbr.rel (!%p20_p5) target bundleno = 7 (0x7), region = 97 }
 0x29b   :  { %1924 = vsyncpa [#allocation3], 1 }
 0x29c   :  { %1926 = vsyncpa [#allocation3 + $0x1], 1 }
 0x29d   :  { %1927 = vsyncpa [#allocation6], 1 }
 0x29e   :  { %1928 = vsyncpa [#allocation4], 1 }
 0x29f   :  { %1930 = vsyncpa [#allocation4 + $0x1], 1 }
 0x2a0   :  { %1931 = vsyncpa [#allocation10], 1 }

</bundles_post_ra>
